<compile_context>
chip_gen: v5e
topology: v5e:2x2
jax: 0.10.0
libtpu: 0.0.40
codegen_flags: <defaults>
</compile_context>

<pallas_src>
import math
import functools

import numpy as np
import jax
import jax.numpy as jnp
from jax.experimental import pallas as pl
from jax.experimental.pallas import tpu as pltpu

_UNROLL_BB = 4  # static unroll threshold for the per-batch attention body


# ----------------------------------------------------------------------------
# Kernel: one grid step == BB batch elements.  Both LayerNorms, QKV projection,
# masked local attention, output projection, feed-forward and both residual
# adds run inside the kernel.
# ----------------------------------------------------------------------------
def block_kernel(x_ref, pad_ref,
                 pre_g_ref, pre_b_ref,
                 wqkv_ref, bqkv_ref, wproj_ref, bproj_ref,
                 aft_g_ref, aft_b_ref,
                 w1_ref, b1_ref, w2_ref, b2_ref,
                 o_ref, *scratch,
                 n_head, eps, local_size, use_loop):
    BB, T, C = x_ref.shape
    hd = C // n_head
    R = BB * T
    attn_scr = scratch[0]                               # (BB, T, C) f32
    qkv_scr = scratch[1] if use_loop else None          # (BB, T, 3C) f32 (loop path)

    x = x_ref[...]                                      # (BB, T, C) f32
    xr = x.reshape(R, C)                                # leading-dim merge (free)

    # Local band mask, generated in-kernel (no (T,T) input / DMA).
    # Matches: ~(tril(d=local) & triu(d=-local)), then row 0 / col 0 opened.
    row = jax.lax.broadcasted_iota(jnp.int32, (T, T), 0)
    col = jax.lax.broadcasted_iota(jnp.int32, (T, T), 1)
    band = jnp.logical_and(col - row <= local_size, row - col <= local_size)
    open_rc = jnp.logical_or(row == 0, col == 0)
    lmask = jnp.logical_and(jnp.logical_not(band), jnp.logical_not(open_rc))
    # Fused mask fill: locally-masked -> -inf ; padded-key (and not local) -> -100
    fill = jnp.where(lmask, jnp.float32(-jnp.inf), jnp.float32(-100.0))

    def layernorm(h, g_ref, b_ref):
        mu = jnp.mean(h, axis=-1, keepdims=True)
        var = jnp.mean(jnp.square(h - mu), axis=-1, keepdims=True)
        return (h - mu) * jax.lax.rsqrt(var + eps) * g_ref[...] + b_ref[...]

    # ------------------------- attention branch -----------------------------
    h = layernorm(xr, pre_g_ref, pre_b_ref)                             # (R, C)
    # 1/sqrt(hd) is already folded into the Q columns of wqkv_t / bqkv.
    qkv = jnp.dot(h.astype(jnp.bfloat16), wqkv_ref[...],
                  preferred_element_type=jnp.float32) + bqkv_ref[...]   # (R, 3C)

    def one_batch(qkv_b, pad_b):
        # qkv_b: (T, 3C) f32 ; pad_b: (1, T) f32 (1.0 = padded position)
        # One 2-D transpose + sublane-split reshape -> head-major tensors.
        # (hd % 8 == 0 and T % 8 == 0 keep these reshapes relayout-free.)
        qkv_t = qkv_b.T.reshape(3 * n_head, hd, T)                      # (3nH, hd, T)
        q_t = qkv_t[:n_head].astype(jnp.bfloat16)
        k_t = qkv_t[n_head:2 * n_head].astype(jnp.bfloat16)
        v_t = qkv_t[2 * n_head:].astype(jnp.bfloat16)

        # Scores for all heads in one batched matmul: contract hd -> (nH, Tq, Tk)
        s = jnp.einsum('hdq,hdk->hqk', q_t, k_t,
                       preferred_element_type=jnp.float32)
        sel = jnp.logical_or(lmask, pad_b > 0.5)                        # (Tq, Tk)
        s = jnp.where(sel, fill, s)
        # col 0 of the local mask is always open, so no row is all -inf.

        m = jnp.max(s, axis=-1, keepdims=True)
        e = jnp.exp(s - m)
        p = e * pl.reciprocal(jnp.sum(e, axis=-1, keepdims=True), approx=True)

        # out^T = V^T @ P^T for all heads: contract Tk -> (nH, hd, Tq)
        o_t = jnp.einsum('hdk,hqk->hdq', v_t, p.astype(jnp.bfloat16),
                         preferred_element_type=jnp.float32)
        # Query-padding row scaling, hoisted out of the softmax (lane broadcast).
        o_t = o_t * (1.0 - pad_b)
        return o_t.reshape(C, T).T                                      # (T, C)

    if use_loop:
        # Bounded-live-range path for large BB: one traced body, no unroll.
        qkv_scr[...] = qkv.reshape(BB, T, 3 * C)

        def body(b, carry):
            attn_scr[b] = one_batch(qkv_scr[b], pad_ref[b])
            return carry

        jax.lax.fori_loop(0, BB, body, 0)
    else:
        qkv3 = qkv.reshape(BB, T, 3 * C)
        for b in range(BB):                         # small static unroll (BB <= 4)
            attn_scr[b] = one_batch(qkv3[b], pad_ref[b])

    attn = attn_scr[...].reshape(R, C)
    attn = jnp.dot(attn.astype(jnp.bfloat16), wproj_ref[...],
                   preferred_element_type=jnp.float32) + bproj_ref[...]
    x1 = xr + attn                                  # attn/value dropout = identity

    # ------------------------- feed-forward branch ---------------------------
    h2 = layernorm(x1, aft_g_ref, aft_b_ref)
    f = jnp.dot(h2.astype(jnp.bfloat16), w1_ref[...],
                preferred_element_type=jnp.float32) + b1_ref[...]
    f = jnp.maximum(f, 0.0)                                              # ReLU
    f = jnp.dot(f.astype(jnp.bfloat16), w2_ref[...],
                preferred_element_type=jnp.float32) + b2_ref[...]
    # ff dropout is identity in eval mode
    o_ref[...] = (x1 + f).reshape(BB, T, C).astype(o_ref.dtype)


# ----------------------------------------------------------------------------
# One-time parameter prep (hoisted out of the forward path): transpose weights
# so the kernel does plain (rows,K)@(K,N) matmuls, fold the 1/sqrt(hd) score
# scale into the Q columns of Wqkv / bqkv, and cast matmul weights to bf16.
# ----------------------------------------------------------------------------
def prepare_block_params(params, n_head, matmul_dtype=jnp.bfloat16):
    row = lambda v: jnp.asarray(v, jnp.float32).reshape(1, -1)
    wqkv = jnp.asarray(params["wqkv"], jnp.float32)          # (3C, C)
    bqkv = jnp.asarray(params["bqkv"], jnp.float32)          # (3C,)
    C = wqkv.shape[1]
    assert C % n_head == 0, "n_dim must be divisible by n_head"
    scale = 1.0 / math.sqrt(C // n_head)
    qscale = jnp.concatenate([jnp.full((C,), scale, jnp.float32),
                              jnp.ones((2 * C,), jnp.float32)])
    wqkv = wqkv * qscale[:, None]
    bqkv = bqkv * qscale
    return {
        "pre_g": row(params["pre_g"]), "pre_b": row(params["pre_b"]),
        "aft_g": row(params["aft_g"]), "aft_b": row(params["aft_b"]),
        "wqkv_t": wqkv.T.astype(matmul_dtype),                            # (C, 3C)
        "bqkv": bqkv.reshape(1, -1),
        "wproj_t": jnp.asarray(params["wproj"], jnp.float32).T.astype(matmul_dtype),
        "bproj": row(params["bproj"]),
        "w1_t": jnp.asarray(params["w1"], jnp.float32).T.astype(matmul_dtype),
        "b1": row(params["b1"]),
        "w2_t": jnp.asarray(params["w2"], jnp.float32).T.astype(matmul_dtype),
        "b2": row(params["b2"]),
    }


# ----------------------------------------------------------------------------
# Generation-aware VMEM budget + batch-block picker
# ----------------------------------------------------------------------------
def _vmem_budget_bytes():
    cap = 64 * 1024 * 1024            # conservative fallback (safe on v7x)
    try:
        cap = int(pltpu.get_tpu_info().vmem_capacity_bytes)
    except Exception:
        pass
    # ~75% of physical with headroom: ~96 MiB on v5e/v6e, ~48 MiB on v7x.
    return min((cap * 3) // 4, 100 * 1024 * 1024)


def _estimate_vmem_bytes(bb, T, C, n_head):
    rows = bb * T
    H = 4 * C
    weights = 2 * (3 * C * C + C * C + 2 * C * H)        # bf16, single-buffered
    xio = 2 * 2 * 4 * rows * C                           # x in + out, double-buffered f32
    unrolled = bb <= _UNROLL_BB
    scratch = 4 * rows * C + (0 if unrolled else 4 * rows * 3 * C)
    transients = 4 * rows * (3 * C + H + 2 * C)          # qkv / ff-hidden / LN values
    scores = 4 * n_head * T * T * (bb if unrolled else 1)
    return weights + xio + scratch + transients + scores


def _pick_batch_block(B, T, C, n_head, vmem_budget, target_rows=1024):
    """Largest divisor of B whose estimated VMEM footprint fits the budget,
    with R = bb*T <= target_rows, preferring an even number of grid steps."""
    feasible = [1]
    for d in range(2, B + 1):
        if B % d:
            continue
        steps = B // d
        if steps < 2 <= B:                 # keep >= 2 grid steps when B >= 2
            continue
        if d * T > target_rows:
            continue
        if _estimate_vmem_bytes(d, T, C, n_head) > vmem_budget:
            continue
        feasible.append(d)
    # Prefer an even grid-step count (both TensorCores busy on megacore/v7x),
    # then the largest row tile (ideally R a multiple of 256 for the MXU).
    feasible.sort(key=lambda d: ((B // d) % 2 == 0, d))
    return feasible[-1]


# ----------------------------------------------------------------------------
# Wrapper: parameter plumbing + pallas_call
# ----------------------------------------------------------------------------
def block_forward(x, pad_mask, prep, n_head, local_size, eps=1e-5,
                  batch_block=None, target_rows=1024):
    B, T, C = x.shape
    assert C % n_head == 0, "n_dim must be divisible by n_head"
    H = 4 * C
    vmem_budget = _vmem_budget_bytes()
    bb = (_pick_batch_block(B, T, C, n_head, vmem_budget, target_rows)
          if batch_block is None else batch_block)
    assert B % bb == 0
    use_loop = bb > _UNROLL_BB

    if pad_mask is None:                               # PyTorch default: no padding
        pad_mask = jnp.zeros((B, T), jnp.float32)
    pad3 = pad_mask.astype(jnp.float32).reshape(B, 1, T)

    kernel = functools.partial(block_kernel, n_head=n_head, eps=eps,
                               local_size=int(local_size), use_loop=use_loop)

    scratch_shapes = [pltpu.VMEM((bb, T, C), jnp.float32)]       # attention out
    if use_loop:
        scratch_shapes.append(pltpu.VMEM((bb, T, 3 * C), jnp.float32))  # qkv

    bspec = lambda shape: pl.BlockSpec((bb,) + shape, lambda i: (i, 0, 0))

    def run(single_buffer_weights):
        def cspec(shape):
            idx = lambda i: (0,) * len(shape)
            if single_buffer_weights:
                try:
                    # constant index_map -> double buffering is pure VMEM waste
                    return pl.BlockSpec(shape, idx, pipeline_mode=pl.Buffered(1))
                except Exception:
                    pass
            return pl.BlockSpec(shape, idx)

        return pl.pallas_call(
            kernel,
            out_shape=jax.ShapeDtypeStruct((B, T, C), jnp.float32),
            grid=(B // bb,),
            in_specs=[
                bspec((T, C)),                          # x
                bspec((1, T)),                          # padding row (B, 1, T)
                cspec((1, C)), cspec((1, C)),           # pre_ln gamma / beta
                cspec((C, 3 * C)), cspec((1, 3 * C)),   # Wqkv^T (bf16, Q pre-scaled)
                cspec((C, C)), cspec((1, C)),           # Wproj^T (bf16), bproj
                cspec((1, C)), cspec((1, C)),           # aft_ln gamma / beta
                cspec((C, H)), cspec((1, H)),           # W1^T (bf16), b1
                cspec((H, C)), cspec((1, C)),           # W2^T (bf16), b2
            ],
            out_specs=bspec((T, C)),
            scratch_shapes=scratch_shapes,
            compiler_params=pltpu.CompilerParams(
                dimension_semantics=("parallel",),
                vmem_limit_bytes=int(vmem_budget)),
        )(x.astype(jnp.float32), pad3,
          prep["pre_g"], prep["pre_b"],
          prep["wqkv_t"], prep["bqkv"], prep["wproj_t"], prep["bproj"],
          prep["aft_g"], prep["aft_b"],
          prep["w1_t"], prep["b1"], prep["w2_t"], prep["b2"])

    try:
        return run(True)
    except Exception:
        # pipeline_mode=pl.Buffered(1) rejected by this JAX/Mosaic build:
        # fall back to the default (double-buffered) constant specs.
        return run(False)


# ----------------------------------------------------------------------------
# Pure-JAX reference (mirrors the PyTorch forward, eval mode, f32)
# ----------------------------------------------------------------------------
def block_reference(x, pad_mask, params, local_mask, n_head, eps=1e-5):
    B, T, C = x.shape
    hd = C // n_head
    pad = pad_mask.astype(jnp.float32)
    pad_b = pad > 0.5
    lmask = local_mask[:T, :T]

    def ln(h, g, b):
        mu = h.mean(-1, keepdims=True)
        var = ((h - mu) ** 2).mean(-1, keepdims=True)
        return (h - mu) / jnp.sqrt(var + eps) * g + b

    h = ln(x, params["pre_g"], params["pre_b"])
    qkv = h @ params["wqkv"].T + params["bqkv"]
    q, k, v = jnp.split(qkv, 3, axis=-1)
    q = q.reshape(B, T, n_head, hd).transpose(0, 2, 1, 3)
    k = k.reshape(B, T, n_head, hd).transpose(0, 2, 1, 3)
    v = v.reshape(B, T, n_head, hd).transpose(0, 2, 1, 3)
    s = jnp.einsum("bhqd,bhkd->bhqk", q, k) / math.sqrt(hd)
    s = jnp.where(pad_b[:, None, None, :], -100.0, s)
    s = jnp.where(lmask[None, None], -jnp.inf, s)
    a = jax.nn.softmax(s, axis=-1)
    a = a * (1.0 - pad)[:, None, :, None]
    o = jnp.einsum("bhqk,bhkd->bhqd", a, v)
    o = o.transpose(0, 2, 1, 3).reshape(B, T, C)
    o = o @ params["wproj"].T + params["bproj"]
    x1 = x + o
    f = ln(x1, params["aft_g"], params["aft_b"])
    f = jnp.maximum(f @ params["w1"].T + params["b1"], 0.0)
    f = f @ params["w2"].T + params["b2"]
    return x1 + f


def make_local_mask(block_size, local_size):
    band = np.tril(np.ones((block_size, block_size), dtype=bool), k=local_size) \
         & np.triu(np.ones((block_size, block_size), dtype=bool), k=-local_size)
    mask = ~band
    mask[0, :] = False
    mask[:, 0] = False
    return jnp.asarray(mask)


if __name__ == "__main__":
    def make_params(key, n_dim):
        ks = jax.random.split(key, 8)
        init = lambda k, shape: (0.05 * jax.random.normal(k, shape)).astype(jnp.float32)
        return {
            "pre_g": jnp.ones((n_dim,), jnp.float32),
            "pre_b": jnp.zeros((n_dim,), jnp.float32),
            "aft_g": jnp.ones((n_dim,), jnp.float32),
            "aft_b": jnp.zeros((n_dim,), jnp.float32),
            "wqkv": init(ks[0], (3 * n_dim, n_dim)),
            "bqkv": init(ks[1], (3 * n_dim,)),
            "wproj": init(ks[2], (n_dim, n_dim)),
            "bproj": init(ks[3], (n_dim,)),
            "w1": init(ks[4], (4 * n_dim, n_dim)),
            "b1": init(ks[5], (4 * n_dim,)),
            "w2": init(ks[6], (n_dim, 4 * n_dim)),
            "b2": init(ks[7], (n_dim,)),
        }

    key = jax.random.PRNGKey(0)
    # (B, T, n_dim, n_head, local_size, block_size):
    #   config 1 exercises the small-BB static-unroll path,
    #   config 2 (larger batch) exercises the fori_loop attention path.
    configs = [
        (2, 8, 32, 4, 2, 16),
        (16, 8, 32, 4, 2, 16),
    ]
    for (B, T, n_dim, n_head, local_size, block_size) in configs:
        key, kp, kx = jax.random.split(key, 3)
        params = make_params(kp, n_dim)
        x = jax.random.normal(kx, (B, T, n_dim), dtype=jnp.float32)
        # pad one trailing position of the last batch element to exercise masking
        pad_mask = jnp.zeros((B, T), jnp.float32).at[B - 1, T - 1].set(1.0)

        prep = prepare_block_params(params, n_head)     # transpose/scale/cast hoisted
        out = jax.block_until_ready(
            block_forward(x, pad_mask, prep, n_head, local_size))

        local_mask = make_local_mask(block_size, local_size)
        ref = block_reference(x, pad_mask, params, local_mask, n_head)
        # bf16 matmul operands (f32 accumulation) + approx reciprocal softmax
        # -> compare at bf16-level tolerance
        np.testing.assert_allclose(np.asarray(out), np.asarray(ref),
                                   rtol=2e-2, atol=2e-2)
    print("KERNEL_OK")
</pallas_src>

<mosaic_0001>
module attributes {stable_mosaic.version = 11 : i64} {
  func.func @block_kernel(%arg0: i32, %arg1: memref<1x8x32xf32, #tpu.memory_space<vmem>>, %arg2: memref<1x1x8xf32, #tpu.memory_space<vmem>>, %arg3: memref<1x32xf32, #tpu.memory_space<vmem>>, %arg4: memref<1x32xf32, #tpu.memory_space<vmem>>, %arg5: memref<32x96xbf16, #tpu.memory_space<vmem>>, %arg6: memref<1x96xf32, #tpu.memory_space<vmem>>, %arg7: memref<32x32xbf16, #tpu.memory_space<vmem>>, %arg8: memref<1x32xf32, #tpu.memory_space<vmem>>, %arg9: memref<1x32xf32, #tpu.memory_space<vmem>>, %arg10: memref<1x32xf32, #tpu.memory_space<vmem>>, %arg11: memref<32x128xbf16, #tpu.memory_space<vmem>>, %arg12: memref<1x128xf32, #tpu.memory_space<vmem>>, %arg13: memref<128x32xbf16, #tpu.memory_space<vmem>>, %arg14: memref<1x32xf32, #tpu.memory_space<vmem>>, %arg15: memref<1x8x32xf32, #tpu.memory_space<vmem>>, %arg16: memref<1x8x32xf32, #tpu.memory_space<vmem>>) attributes {dimension_semantics = [#tpu.dimension_semantics<parallel>], iteration_bounds = array<i64: 2>, scalar_prefetch = 0 : i64, scratch_operands = 1 : i64, tpu.core_type = #tpu.core_type<tc>, window_params = [{transform_indices = @transform_0, window_bounds = array<i64: 1, 8, 32>}, {transform_indices = @transform_1, window_bounds = array<i64: 1, 1, 8>}, {pipeline_mode = #tpu.pipeline_mode<synchronous>, transform_indices = @transform_2, window_bounds = array<i64: 1, 32>}, {pipeline_mode = #tpu.pipeline_mode<synchronous>, transform_indices = @transform_3, window_bounds = array<i64: 1, 32>}, {pipeline_mode = #tpu.pipeline_mode<synchronous>, transform_indices = @transform_4, window_bounds = array<i64: 32, 96>}, {pipeline_mode = #tpu.pipeline_mode<synchronous>, transform_indices = @transform_5, window_bounds = array<i64: 1, 96>}, {pipeline_mode = #tpu.pipeline_mode<synchronous>, transform_indices = @transform_6, window_bounds = array<i64: 32, 32>}, {pipeline_mode = #tpu.pipeline_mode<synchronous>, transform_indices = @transform_7, window_bounds = array<i64: 1, 32>}, {pipeline_mode = #tpu.pipeline_mode<synchronous>, transform_indices = @transform_8, window_bounds = array<i64: 1, 32>}, {pipeline_mode = #tpu.pipeline_mode<synchronous>, transform_indices = @transform_9, window_bounds = array<i64: 1, 32>}, {pipeline_mode = #tpu.pipeline_mode<synchronous>, transform_indices = @transform_10, window_bounds = array<i64: 32, 128>}, {pipeline_mode = #tpu.pipeline_mode<synchronous>, transform_indices = @transform_11, window_bounds = array<i64: 1, 128>}, {pipeline_mode = #tpu.pipeline_mode<synchronous>, transform_indices = @transform_12, window_bounds = array<i64: 128, 32>}, {pipeline_mode = #tpu.pipeline_mode<synchronous>, transform_indices = @transform_13, window_bounds = array<i64: 1, 32>}, {transform_indices = @transform_14, window_bounds = array<i64: 1, 8, 32>}]} {
    %c0 = arith.constant 0 : index
    %c0_0 = arith.constant 0 : index
    %c0_1 = arith.constant 0 : index
    %0 = vector.load %arg1[%c0, %c0_0, %c0_1] : memref<1x8x32xf32, #tpu.memory_space<vmem>>, vector<1x8x32xf32>
    %1 = vector.shape_cast %0 : vector<1x8x32xf32> to vector<8x32xf32>
    %2 = tpu.iota {dimensions = array<i32: 0>} : vector<8x8xi32>
    %3 = tpu.iota {dimensions = array<i32: 1>} : vector<8x8xi32>
    %4 = arith.subi %3, %2 : vector<8x8xi32>
    %c2_i32 = arith.constant 2 : i32
    %5 = vector.broadcast %c2_i32 : i32 to vector<8x8xi32>
    %6 = arith.cmpi sle, %4, %5 : vector<8x8xi32>
    %7 = arith.subi %2, %3 : vector<8x8xi32>
    %c2_i32_2 = arith.constant 2 : i32
    %8 = vector.broadcast %c2_i32_2 : i32 to vector<8x8xi32>
    %9 = arith.cmpi sle, %7, %8 : vector<8x8xi32>
    %10 = arith.andi %6, %9 : vector<8x8xi1>
    %c0_i32 = arith.constant 0 : i32
    %11 = vector.broadcast %c0_i32 : i32 to vector<8x8xi32>
    %12 = arith.cmpi eq, %2, %11 : vector<8x8xi32>
    %c0_i32_3 = arith.constant 0 : i32
    %13 = vector.broadcast %c0_i32_3 : i32 to vector<8x8xi32>
    %14 = arith.cmpi eq, %3, %13 : vector<8x8xi32>
    %15 = arith.ori %12, %14 : vector<8x8xi1>
    %cst = arith.constant dense<true> : vector<8x8xi1>
    %16 = arith.xori %10, %cst : vector<8x8xi1>
    %cst_4 = arith.constant dense<true> : vector<8x8xi1>
    %17 = arith.xori %15, %cst_4 : vector<8x8xi1>
    %18 = arith.andi %16, %17 : vector<8x8xi1>
    %cst_5 = arith.constant 0xFF800000 : f32
    %cst_6 = arith.constant -1.000000e+02 : f32
    %19 = vector.broadcast %cst_5 : f32 to vector<8x8xf32>
    %20 = vector.broadcast %cst_6 : f32 to vector<8x8xf32>
    %21 = arith.select %18, %19, %20 : vector<8x8xi1>, vector<8x8xf32>
    %cst_7 = arith.constant dense<0.000000e+00> : vector<8xf32>
    %22 = vector.multi_reduction <add>, %1, %cst_7 [1] : vector<8x32xf32> to vector<8xf32>
    %23 = vector.shape_cast %22 : vector<8xf32> to vector<8x1xf32>
    %cst_8 = arith.constant 3.200000e+01 : f32
    %24 = vector.broadcast %cst_8 : f32 to vector<8x1xf32>
    %25 = arith.divf %23, %24 : vector<8x1xf32>
    %26 = vector.broadcast %25 : vector<8x1xf32> to vector<8x32xf32>
    %27 = arith.subf %1, %26 : vector<8x32xf32>
    %28 = arith.mulf %27, %27 : vector<8x32xf32>
    %cst_9 = arith.constant dense<0.000000e+00> : vector<8xf32>
    %29 = vector.multi_reduction <add>, %28, %cst_9 [1] : vector<8x32xf32> to vector<8xf32>
    %30 = vector.shape_cast %29 : vector<8xf32> to vector<8x1xf32>
    %cst_10 = arith.constant 3.200000e+01 : f32
    %31 = vector.broadcast %cst_10 : f32 to vector<8x1xf32>
    %32 = arith.divf %30, %31 : vector<8x1xf32>
    %33 = vector.broadcast %25 : vector<8x1xf32> to vector<8x32xf32>
    %34 = arith.subf %1, %33 : vector<8x32xf32>
    %cst_11 = arith.constant 9.99999974E-6 : f32
    %35 = vector.broadcast %cst_11 : f32 to vector<8x1xf32>
    %36 = arith.addf %32, %35 : vector<8x1xf32>
    %37 = math.rsqrt %36 : vector<8x1xf32>
    %38 = vector.broadcast %37 : vector<8x1xf32> to vector<8x32xf32>
    %39 = arith.mulf %34, %38 : vector<8x32xf32>
    %c0_12 = arith.constant 0 : index
    %c0_13 = arith.constant 0 : index
    %40 = vector.load %arg3[%c0_12, %c0_13] : memref<1x32xf32, #tpu.memory_space<vmem>>, vector<1x32xf32>
    %41 = vector.broadcast %40 : vector<1x32xf32> to vector<8x32xf32>
    %42 = arith.mulf %39, %41 : vector<8x32xf32>
    %c0_14 = arith.constant 0 : index
    %c0_15 = arith.constant 0 : index
    %43 = vector.load %arg4[%c0_14, %c0_15] : memref<1x32xf32, #tpu.memory_space<vmem>>, vector<1x32xf32>
    %44 = vector.broadcast %43 : vector<1x32xf32> to vector<8x32xf32>
    %45 = arith.addf %42, %44 : vector<8x32xf32>
    %46 = arith.truncf %45 : vector<8x32xf32> to vector<8x32xbf16>
    %c0_16 = arith.constant 0 : index
    %c0_17 = arith.constant 0 : index
    %47 = vector.load %arg5[%c0_16, %c0_17] : memref<32x96xbf16, #tpu.memory_space<vmem>>, vector<32x96xbf16>
    %cst_18 = arith.constant dense<0.000000e+00> : vector<8x96xf32>
    %48 = tpu.matmul %46, %47, %cst_18 {dimension_numbers = #tpu.dot_dimension_numbers<[1], [0], [0], [1], [0, 0, 1, 1], [], []>} : vector<8x32xbf16>, vector<32x96xbf16>, vector<8x96xf32> -> vector<8x96xf32>
    %c0_19 = arith.constant 0 : index
    %c0_20 = arith.constant 0 : index
    %49 = vector.load %arg6[%c0_19, %c0_20] : memref<1x96xf32, #tpu.memory_space<vmem>>, vector<1x96xf32>
    %50 = vector.broadcast %49 : vector<1x96xf32> to vector<8x96xf32>
    %51 = arith.addf %48, %50 : vector<8x96xf32>
    %52 = vector.shape_cast %51 : vector<8x96xf32> to vector<1x8x96xf32>
    %53 = vector.shape_cast %52 : vector<1x8x96xf32> to vector<8x96xf32>
    %c0_21 = arith.constant 0 : index
    %c0_22 = arith.constant 0 : index
    %c0_23 = arith.constant 0 : index
    %54 = vector.load %arg2[%c0_21, %c0_22, %c0_23] : memref<1x1x8xf32, #tpu.memory_space<vmem>>, vector<1x1x8xf32>
    %55 = vector.shape_cast %54 : vector<1x1x8xf32> to vector<1x8xf32>
    %56 = tpu.transpose %53, [1, 0] : vector<8x96xf32> -> vector<96x8xf32>
    %57 = vector.shape_cast %56 : vector<96x8xf32> to vector<12x8x8xf32>
    %58 = vector.extract_strided_slice %57 {offsets = [0, 0, 0], sizes = [4, 8, 8], strides = [1, 1, 1]} : vector<12x8x8xf32> to vector<4x8x8xf32>
    %59 = arith.truncf %58 : vector<4x8x8xf32> to vector<4x8x8xbf16>
    %60 = vector.extract_strided_slice %57 {offsets = [4, 0, 0], sizes = [4, 8, 8], strides = [1, 1, 1]} : vector<12x8x8xf32> to vector<4x8x8xf32>
    %61 = arith.truncf %60 : vector<4x8x8xf32> to vector<4x8x8xbf16>
    %62 = vector.extract_strided_slice %57 {offsets = [8, 0, 0], sizes = [4, 8, 8], strides = [1, 1, 1]} : vector<12x8x8xf32> to vector<4x8x8xf32>
    %63 = arith.truncf %62 : vector<4x8x8xf32> to vector<4x8x8xbf16>
    "tpu.trace_start"() <{level = 10 : i32, message = "hdq,hdk->hqk"}> : () -> ()
    %cst_24 = arith.constant dense<0.000000e+00> : vector<4x8x8xf32>
    %64 = tpu.matmul %59, %61, %cst_24 {dimension_numbers = #tpu.dot_dimension_numbers<[1], [1], [2], [2], [0, 0, 0, 2, 1, 2], [0], [0]>} : vector<4x8x8xbf16>, vector<4x8x8xbf16>, vector<4x8x8xf32> -> vector<4x8x8xf32>
    %cst_25 = arith.constant 5.000000e-01 : f32
    "tpu.trace_stop"() : () -> ()
    %65 = vector.broadcast %cst_25 : f32 to vector<1x8xf32>
    %66 = arith.cmpf ogt, %55, %65 : vector<1x8xf32>
    %67 = vector.broadcast %66 : vector<1x8xi1> to vector<8x8xi1>
    %68 = arith.ori %18, %67 : vector<8x8xi1>
    %69 = vector.shape_cast %68 : vector<8x8xi1> to vector<1x8x8xi1>
    %70 = vector.broadcast %69 : vector<1x8x8xi1> to vector<4x8x8xi1>
    %71 = vector.shape_cast %21 : vector<8x8xf32> to vector<1x8x8xf32>
    %72 = vector.broadcast %71 : vector<1x8x8xf32> to vector<4x8x8xf32>
    %73 = arith.select %70, %72, %64 : vector<4x8x8xi1>, vector<4x8x8xf32>
    %cst_26 = arith.constant dense<0xFF800000> : vector<4x8xf32>
    %74 = vector.multi_reduction <maximumf>, %73, %cst_26 [2] : vector<4x8x8xf32> to vector<4x8xf32>
    %75 = vector.shape_cast %74 : vector<4x8xf32> to vector<4x8x1xf32>
    %76 = vector.broadcast %75 : vector<4x8x1xf32> to vector<4x8x8xf32>
    %77 = arith.subf %73, %76 : vector<4x8x8xf32>
    %78 = math.exp %77 : vector<4x8x8xf32>
    %cst_27 = arith.constant dense<0.000000e+00> : vector<4x8xf32>
    %79 = vector.multi_reduction <add>, %78, %cst_27 [2] : vector<4x8x8xf32> to vector<4x8xf32>
    %80 = vector.shape_cast %79 : vector<4x8xf32> to vector<4x8x1xf32>
    %81 = tpu.reciprocal %80 {approx = true} : vector<4x8x1xf32> -> vector<4x8x1xf32>
    %82 = vector.broadcast %81 : vector<4x8x1xf32> to vector<4x8x8xf32>
    %83 = arith.mulf %78, %82 : vector<4x8x8xf32>
    %84 = arith.truncf %83 : vector<4x8x8xf32> to vector<4x8x8xbf16>
    "tpu.trace_start"() <{level = 10 : i32, message = "hdk,hqk->hdq"}> : () -> ()
    %cst_28 = arith.constant dense<0.000000e+00> : vector<4x8x8xf32>
    %85 = tpu.matmul %63, %84, %cst_28 {dimension_numbers = #tpu.dot_dimension_numbers<[2], [2], [1], [1], [0, 0, 0, 1, 1, 1], [0], [0]>} : vector<4x8x8xbf16>, vector<4x8x8xbf16>, vector<4x8x8xf32> -> vector<4x8x8xf32>
    "tpu.trace_stop"() : () -> ()
    %cst_29 = arith.constant 1.000000e+00 : f32
    %86 = vector.broadcast %cst_29 : f32 to vector<1x8xf32>
    %87 = arith.subf %86, %55 : vector<1x8xf32>
    %88 = vector.shape_cast %87 : vector<1x8xf32> to vector<1x1x8xf32>
    %89 = vector.broadcast %88 : vector<1x1x8xf32> to vector<4x8x8xf32>
    %90 = arith.mulf %85, %89 : vector<4x8x8xf32>
    %91 = vector.shape_cast %90 : vector<4x8x8xf32> to vector<32x8xf32>
    %92 = tpu.transpose %91, [1, 0] : vector<32x8xf32> -> vector<8x32xf32>
    %c0_30 = arith.constant 0 : index
    %c0_31 = arith.constant 0 : index
    %c0_32 = arith.constant 0 : index
    %93 = vector.load %arg16[%c0_30, %c0_31, %c0_32] : memref<1x8x32xf32, #tpu.memory_space<vmem>>, vector<1x8x32xf32>
    %94 = vector.shape_cast %93 : vector<1x8x32xf32> to vector<8x32xf32>
    %95 = vector.shape_cast %92 : vector<8x32xf32> to vector<1x8x32xf32>
    tpu.vector_store %arg16[%c0_30, %c0_31, %c0_32], %95 {strides = array<i32>} : memref<1x8x32xf32, #tpu.memory_space<vmem>>, vector<1x8x32xf32>,
    %c0_33 = arith.constant 0 : index
    %c0_34 = arith.constant 0 : index
    %c0_35 = arith.constant 0 : index
    %96 = vector.load %arg16[%c0_33, %c0_34, %c0_35] : memref<1x8x32xf32, #tpu.memory_space<vmem>>, vector<1x8x32xf32>
    %97 = vector.shape_cast %96 : vector<1x8x32xf32> to vector<8x32xf32>
    %98 = arith.truncf %97 : vector<8x32xf32> to vector<8x32xbf16>
    %c0_36 = arith.constant 0 : index
    %c0_37 = arith.constant 0 : index
    %99 = vector.load %arg7[%c0_36, %c0_37] : memref<32x32xbf16, #tpu.memory_space<vmem>>, vector<32x32xbf16>
    %cst_38 = arith.constant dense<0.000000e+00> : vector<8x32xf32>
    %100 = tpu.matmul %98, %99, %cst_38 {dimension_numbers = #tpu.dot_dimension_numbers<[1], [0], [0], [1], [0, 0, 1, 1], [], []>} : vector<8x32xbf16>, vector<32x32xbf16>, vector<8x32xf32> -> vector<8x32xf32>
    %c0_39 = arith.constant 0 : index
    %c0_40 = arith.constant 0 : index
    %101 = vector.load %arg8[%c0_39, %c0_40] : memref<1x32xf32, #tpu.memory_space<vmem>>, vector<1x32xf32>
    %102 = vector.broadcast %101 : vector<1x32xf32> to vector<8x32xf32>
    %103 = arith.addf %100, %102 : vector<8x32xf32>
    %104 = arith.addf %1, %103 : vector<8x32xf32>
    %cst_41 = arith.constant dense<0.000000e+00> : vector<8xf32>
    %105 = vector.multi_reduction <add>, %104, %cst_41 [1] : vector<8x32xf32> to vector<8xf32>
    %106 = vector.shape_cast %105 : vector<8xf32> to vector<8x1xf32>
    %cst_42 = arith.constant 3.200000e+01 : f32
    %107 = vector.broadcast %cst_42 : f32 to vector<8x1xf32>
    %108 = arith.divf %106, %107 : vector<8x1xf32>
    %109 = vector.broadcast %108 : vector<8x1xf32> to vector<8x32xf32>
    %110 = arith.subf %104, %109 : vector<8x32xf32>
    %111 = arith.mulf %110, %110 : vector<8x32xf32>
    %cst_43 = arith.constant dense<0.000000e+00> : vector<8xf32>
    %112 = vector.multi_reduction <add>, %111, %cst_43 [1] : vector<8x32xf32> to vector<8xf32>
    %113 = vector.shape_cast %112 : vector<8xf32> to vector<8x1xf32>
    %cst_44 = arith.constant 3.200000e+01 : f32
    %114 = vector.broadcast %cst_44 : f32 to vector<8x1xf32>
    %115 = arith.divf %113, %114 : vector<8x1xf32>
    %116 = vector.broadcast %108 : vector<8x1xf32> to vector<8x32xf32>
    %117 = arith.subf %104, %116 : vector<8x32xf32>
    %cst_45 = arith.constant 9.99999974E-6 : f32
    %118 = vector.broadcast %cst_45 : f32 to vector<8x1xf32>
    %119 = arith.addf %115, %118 : vector<8x1xf32>
    %120 = math.rsqrt %119 : vector<8x1xf32>
    %121 = vector.broadcast %120 : vector<8x1xf32> to vector<8x32xf32>
    %122 = arith.mulf %117, %121 : vector<8x32xf32>
    %c0_46 = arith.constant 0 : index
    %c0_47 = arith.constant 0 : index
    %123 = vector.load %arg9[%c0_46, %c0_47] : memref<1x32xf32, #tpu.memory_space<vmem>>, vector<1x32xf32>
    %124 = vector.broadcast %123 : vector<1x32xf32> to vector<8x32xf32>
    %125 = arith.mulf %122, %124 : vector<8x32xf32>
    %c0_48 = arith.constant 0 : index
    %c0_49 = arith.constant 0 : index
    %126 = vector.load %arg10[%c0_48, %c0_49] : memref<1x32xf32, #tpu.memory_space<vmem>>, vector<1x32xf32>
    %127 = vector.broadcast %126 : vector<1x32xf32> to vector<8x32xf32>
    %128 = arith.addf %125, %127 : vector<8x32xf32>
    %129 = arith.truncf %128 : vector<8x32xf32> to vector<8x32xbf16>
    %c0_50 = arith.constant 0 : index
    %c0_51 = arith.constant 0 : index
    %130 = vector.load %arg11[%c0_50, %c0_51] : memref<32x128xbf16, #tpu.memory_space<vmem>>, vector<32x128xbf16>
    %cst_52 = arith.constant dense<0.000000e+00> : vector<8x128xf32>
    %131 = tpu.matmul %129, %130, %cst_52 {dimension_numbers = #tpu.dot_dimension_numbers<[1], [0], [0], [1], [0, 0, 1, 1], [], []>} : vector<8x32xbf16>, vector<32x128xbf16>, vector<8x128xf32> -> vector<8x128xf32>
    %c0_53 = arith.constant 0 : index
    %c0_54 = arith.constant 0 : index
    %132 = vector.load %arg12[%c0_53, %c0_54] : memref<1x128xf32, #tpu.memory_space<vmem>>, vector<1x128xf32>
    %133 = vector.broadcast %132 : vector<1x128xf32> to vector<8x128xf32>
    %134 = arith.addf %131, %133 : vector<8x128xf32>
    %cst_55 = arith.constant 0.000000e+00 : f32
    %135 = vector.broadcast %cst_55 : f32 to vector<8x128xf32>
    %136 = arith.maximumf %134, %135 : vector<8x128xf32>
    %137 = arith.truncf %136 : vector<8x128xf32> to vector<8x128xbf16>
    %c0_56 = arith.constant 0 : index
    %c0_57 = arith.constant 0 : index
    %138 = vector.load %arg13[%c0_56, %c0_57] : memref<128x32xbf16, #tpu.memory_space<vmem>>, vector<128x32xbf16>
    %cst_58 = arith.constant dense<0.000000e+00> : vector<8x32xf32>
    %139 = tpu.matmul %137, %138, %cst_58 {dimension_numbers = #tpu.dot_dimension_numbers<[1], [0], [0], [1], [0, 0, 1, 1], [], []>} : vector<8x128xbf16>, vector<128x32xbf16>, vector<8x32xf32> -> vector<8x32xf32>
    %c0_59 = arith.constant 0 : index
    %c0_60 = arith.constant 0 : index
    %140 = vector.load %arg14[%c0_59, %c0_60] : memref<1x32xf32, #tpu.memory_space<vmem>>, vector<1x32xf32>
    %141 = vector.broadcast %140 : vector<1x32xf32> to vector<8x32xf32>
    %142 = arith.addf %139, %141 : vector<8x32xf32>
    %143 = arith.addf %104, %142 : vector<8x32xf32>
    %144 = vector.shape_cast %143 : vector<8x32xf32> to vector<1x8x32xf32>
    %c0_61 = arith.constant 0 : index
    %c0_62 = arith.constant 0 : index
    %c0_63 = arith.constant 0 : index
    %145 = vector.load %arg15[%c0_61, %c0_62, %c0_63] : memref<1x8x32xf32, #tpu.memory_space<vmem>>, vector<1x8x32xf32>
    tpu.vector_store %arg15[%c0_61, %c0_62, %c0_63], %144 {strides = array<i32>} : memref<1x8x32xf32, #tpu.memory_space<vmem>>, vector<1x8x32xf32>,
    return
  }
  func.func @transform_0(%arg0: i32) -> (i32, i32, i32) {
    %c0_i32 = arith.constant 0 : i32
    %c0_i32_0 = arith.constant 0 : i32
    %c0_i32_1 = arith.constant 0 : i32
    return %arg0, %c0_i32, %c0_i32_0 : i32, i32, i32
  }
  func.func @transform_1(%arg0: i32) -> (i32, i32, i32) {
    %c0_i32 = arith.constant 0 : i32
    %c0_i32_0 = arith.constant 0 : i32
    %c0_i32_1 = arith.constant 0 : i32
    return %arg0, %c0_i32, %c0_i32_0 : i32, i32, i32
  }
  func.func @transform_2(%arg0: i32) -> (i32, i32) {
    %c0_i32 = arith.constant 0 : i32
    %c0_i32_0 = arith.constant 0 : i32
    %c0_i32_1 = arith.constant 0 : i32
    return %c0_i32, %c0_i32_0 : i32, i32
  }
  func.func @transform_3(%arg0: i32) -> (i32, i32) {
    %c0_i32 = arith.constant 0 : i32
    %c0_i32_0 = arith.constant 0 : i32
    %c0_i32_1 = arith.constant 0 : i32
    return %c0_i32, %c0_i32_0 : i32, i32
  }
  func.func @transform_4(%arg0: i32) -> (i32, i32) {
    %c0_i32 = arith.constant 0 : i32
    %c0_i32_0 = arith.constant 0 : i32
    %c0_i32_1 = arith.constant 0 : i32
    return %c0_i32, %c0_i32_0 : i32, i32
  }
  func.func @transform_5(%arg0: i32) -> (i32, i32) {
    %c0_i32 = arith.constant 0 : i32
    %c0_i32_0 = arith.constant 0 : i32
    %c0_i32_1 = arith.constant 0 : i32
    return %c0_i32, %c0_i32_0 : i32, i32
  }
  func.func @transform_6(%arg0: i32) -> (i32, i32) {
    %c0_i32 = arith.constant 0 : i32
    %c0_i32_0 = arith.constant 0 : i32
    %c0_i32_1 = arith.constant 0 : i32
    return %c0_i32, %c0_i32_0 : i32, i32
  }
  func.func @transform_7(%arg0: i32) -> (i32, i32) {
    %c0_i32 = arith.constant 0 : i32
    %c0_i32_0 = arith.constant 0 : i32
    %c0_i32_1 = arith.constant 0 : i32
    return %c0_i32, %c0_i32_0 : i32, i32
  }
  func.func @transform_8(%arg0: i32) -> (i32, i32) {
    %c0_i32 = arith.constant 0 : i32
    %c0_i32_0 = arith.constant 0 : i32
    %c0_i32_1 = arith.constant 0 : i32
    return %c0_i32, %c0_i32_0 : i32, i32
  }
  func.func @transform_9(%arg0: i32) -> (i32, i32) {
    %c0_i32 = arith.constant 0 : i32
    %c0_i32_0 = arith.constant 0 : i32
    %c0_i32_1 = arith.constant 0 : i32
    return %c0_i32, %c0_i32_0 : i32, i32
  }
  func.func @transform_10(%arg0: i32) -> (i32, i32) {
    %c0_i32 = arith.constant 0 : i32
    %c0_i32_0 = arith.constant 0 : i32
    %c0_i32_1 = arith.constant 0 : i32
    return %c0_i32, %c0_i32_0 : i32, i32
  }
  func.func @transform_11(%arg0: i32) -> (i32, i32) {
    %c0_i32 = arith.constant 0 : i32
    %c0_i32_0 = arith.constant 0 : i32
    %c0_i32_1 = arith.constant 0 : i32
    return %c0_i32, %c0_i32_0 : i32, i32
  }
  func.func @transform_12(%arg0: i32) -> (i32, i32) {
    %c0_i32 = arith.constant 0 : i32
    %c0_i32_0 = arith.constant 0 : i32
    %c0_i32_1 = arith.constant 0 : i32
    return %c0_i32, %c0_i32_0 : i32, i32
  }
  func.func @transform_13(%arg0: i32) -> (i32, i32) {
    %c0_i32 = arith.constant 0 : i32
    %c0_i32_0 = arith.constant 0 : i32
    %c0_i32_1 = arith.constant 0 : i32
    return %c0_i32, %c0_i32_0 : i32, i32
  }
  func.func @transform_14(%arg0: i32) -> (i32, i32, i32) {
    %c0_i32 = arith.constant 0 : i32
    %c0_i32_0 = arith.constant 0 : i32
    %c0_i32_1 = arith.constant 0 : i32
    return %arg0, %c0_i32, %c0_i32_0 : i32, i32, i32
  }
}

module attributes {stable_mosaic.version = 11 : i64} {
  func.func @block_kernel(%arg0: i32, %arg1: memref<1x8x32xf32, #tpu.memory_space<vmem>>, %arg2: memref<1x1x8xf32, #tpu.memory_space<vmem>>, %arg3: memref<1x32xf32, #tpu.memory_space<vmem>>, %arg4: memref<1x32xf32, #tpu.memory_space<vmem>>, %arg5: memref<32x96xbf16, #tpu.memory_space<vmem>>, %arg6: memref<1x96xf32, #tpu.memory_space<vmem>>, %arg7: memref<32x32xbf16, #tpu.memory_space<vmem>>, %arg8: memref<1x32xf32, #tpu.memory_space<vmem>>, %arg9: memref<1x32xf32, #tpu.memory_space<vmem>>, %arg10: memref<1x32xf32, #tpu.memory_space<vmem>>, %arg11: memref<32x128xbf16, #tpu.memory_space<vmem>>, %arg12: memref<1x128xf32, #tpu.memory_space<vmem>>, %arg13: memref<128x32xbf16, #tpu.memory_space<vmem>>, %arg14: memref<1x32xf32, #tpu.memory_space<vmem>>, %arg15: memref<1x8x32xf32, #tpu.memory_space<vmem>>, %arg16: memref<1x8x32xf32, #tpu.memory_space<vmem>>) attributes {dimension_semantics = [#tpu.dimension_semantics<parallel>], iteration_bounds = array<i64: 2>, scalar_prefetch = 0 : i64, scratch_operands = 1 : i64, tpu.core_type = #tpu.core_type<tc>, window_params = [{transform_indices = @transform_0, window_bounds = array<i64: 1, 8, 32>}, {transform_indices = @transform_1, window_bounds = array<i64: 1, 1, 8>}, {pipeline_mode = #tpu.pipeline_mode<synchronous>, transform_indices = @transform_2, window_bounds = array<i64: 1, 32>}, {pipeline_mode = #tpu.pipeline_mode<synchronous>, transform_indices = @transform_3, window_bounds = array<i64: 1, 32>}, {pipeline_mode = #tpu.pipeline_mode<synchronous>, transform_indices = @transform_4, window_bounds = array<i64: 32, 96>}, {pipeline_mode = #tpu.pipeline_mode<synchronous>, transform_indices = @transform_5, window_bounds = array<i64: 1, 96>}, {pipeline_mode = #tpu.pipeline_mode<synchronous>, transform_indices = @transform_6, window_bounds = array<i64: 32, 32>}, {pipeline_mode = #tpu.pipeline_mode<synchronous>, transform_indices = @transform_7, window_bounds = array<i64: 1, 32>}, {pipeline_mode = #tpu.pipeline_mode<synchronous>, transform_indices = @transform_8, window_bounds = array<i64: 1, 32>}, {pipeline_mode = #tpu.pipeline_mode<synchronous>, transform_indices = @transform_9, window_bounds = array<i64: 1, 32>}, {pipeline_mode = #tpu.pipeline_mode<synchronous>, transform_indices = @transform_10, window_bounds = array<i64: 32, 128>}, {pipeline_mode = #tpu.pipeline_mode<synchronous>, transform_indices = @transform_11, window_bounds = array<i64: 1, 128>}, {pipeline_mode = #tpu.pipeline_mode<synchronous>, transform_indices = @transform_12, window_bounds = array<i64: 128, 32>}, {pipeline_mode = #tpu.pipeline_mode<synchronous>, transform_indices = @transform_13, window_bounds = array<i64: 1, 32>}, {transform_indices = @transform_14, window_bounds = array<i64: 1, 8, 32>}]} {
    %c0 = arith.constant 0 : index
    %c0_0 = arith.constant 0 : index
    %c0_1 = arith.constant 0 : index
    %0 = vector.load %arg1[%c0, %c0_0, %c0_1] : memref<1x8x32xf32, #tpu.memory_space<vmem>>, vector<1x8x32xf32>
    %1 = vector.shape_cast %0 : vector<1x8x32xf32> to vector<8x32xf32>
    %2 = tpu.iota {dimensions = array<i32: 0>} : vector<8x8xi32>
    %3 = tpu.iota {dimensions = array<i32: 1>} : vector<8x8xi32>
    %4 = arith.subi %3, %2 : vector<8x8xi32>
    %c2_i32 = arith.constant 2 : i32
    %5 = vector.broadcast %c2_i32 : i32 to vector<8x8xi32>
    %6 = arith.cmpi sle, %4, %5 : vector<8x8xi32>
    %7 = arith.subi %2, %3 : vector<8x8xi32>
    %c2_i32_2 = arith.constant 2 : i32
    %8 = vector.broadcast %c2_i32_2 : i32 to vector<8x8xi32>
    %9 = arith.cmpi sle, %7, %8 : vector<8x8xi32>
    %10 = arith.andi %6, %9 : vector<8x8xi1>
    %c0_i32 = arith.constant 0 : i32
    %11 = vector.broadcast %c0_i32 : i32 to vector<8x8xi32>
    %12 = arith.cmpi eq, %2, %11 : vector<8x8xi32>
    %c0_i32_3 = arith.constant 0 : i32
    %13 = vector.broadcast %c0_i32_3 : i32 to vector<8x8xi32>
    %14 = arith.cmpi eq, %3, %13 : vector<8x8xi32>
    %15 = arith.ori %12, %14 : vector<8x8xi1>
    %cst = arith.constant dense<true> : vector<8x8xi1>
    %16 = arith.xori %10, %cst : vector<8x8xi1>
    %cst_4 = arith.constant dense<true> : vector<8x8xi1>
    %17 = arith.xori %15, %cst_4 : vector<8x8xi1>
    %18 = arith.andi %16, %17 : vector<8x8xi1>
    %cst_5 = arith.constant 0xFF800000 : f32
    %cst_6 = arith.constant -1.000000e+02 : f32
    %19 = vector.broadcast %cst_5 : f32 to vector<8x8xf32>
    %20 = vector.broadcast %cst_6 : f32 to vector<8x8xf32>
    %21 = arith.select %18, %19, %20 : vector<8x8xi1>, vector<8x8xf32>
    %cst_7 = arith.constant dense<0.000000e+00> : vector<8xf32>
    %22 = vector.multi_reduction <add>, %1, %cst_7 [1] : vector<8x32xf32> to vector<8xf32>
    %23 = vector.shape_cast %22 : vector<8xf32> to vector<8x1xf32>
    %cst_8 = arith.constant 3.200000e+01 : f32
    %24 = vector.broadcast %cst_8 : f32 to vector<8x1xf32>
    %25 = arith.divf %23, %24 : vector<8x1xf32>
    %26 = vector.broadcast %25 : vector<8x1xf32> to vector<8x32xf32>
    %27 = arith.subf %1, %26 : vector<8x32xf32>
    %28 = arith.mulf %27, %27 : vector<8x32xf32>
    %cst_9 = arith.constant dense<0.000000e+00> : vector<8xf32>
    %29 = vector.multi_reduction <add>, %28, %cst_9 [1] : vector<8x32xf32> to vector<8xf32>
    %30 = vector.shape_cast %29 : vector<8xf32> to vector<8x1xf32>
    %cst_10 = arith.constant 3.200000e+01 : f32
    %31 = vector.broadcast %cst_10 : f32 to vector<8x1xf32>
    %32 = arith.divf %30, %31 : vector<8x1xf32>
    %33 = vector.broadcast %25 : vector<8x1xf32> to vector<8x32xf32>
    %34 = arith.subf %1, %33 : vector<8x32xf32>
    %cst_11 = arith.constant 9.99999974E-6 : f32
    %35 = vector.broadcast %cst_11 : f32 to vector<8x1xf32>
    %36 = arith.addf %32, %35 : vector<8x1xf32>
    %37 = math.rsqrt %36 : vector<8x1xf32>
    %38 = vector.broadcast %37 : vector<8x1xf32> to vector<8x32xf32>
    %39 = arith.mulf %34, %38 : vector<8x32xf32>
    %c0_12 = arith.constant 0 : index
    %c0_13 = arith.constant 0 : index
    %40 = vector.load %arg3[%c0_12, %c0_13] : memref<1x32xf32, #tpu.memory_space<vmem>>, vector<1x32xf32>
    %41 = vector.broadcast %40 : vector<1x32xf32> to vector<8x32xf32>
    %42 = arith.mulf %39, %41 : vector<8x32xf32>
    %c0_14 = arith.constant 0 : index
    %c0_15 = arith.constant 0 : index
    %43 = vector.load %arg4[%c0_14, %c0_15] : memref<1x32xf32, #tpu.memory_space<vmem>>, vector<1x32xf32>
    %44 = vector.broadcast %43 : vector<1x32xf32> to vector<8x32xf32>
    %45 = arith.addf %42, %44 : vector<8x32xf32>
    %46 = arith.truncf %45 : vector<8x32xf32> to vector<8x32xbf16>
    %c0_16 = arith.constant 0 : index
    %c0_17 = arith.constant 0 : index
    %47 = vector.load %arg5[%c0_16, %c0_17] : memref<32x96xbf16, #tpu.memory_space<vmem>>, vector<32x96xbf16>
    %cst_18 = arith.constant dense<0.000000e+00> : vector<8x96xf32>
    %48 = tpu.matmul %46, %47, %cst_18 {dimension_numbers = #tpu.dot_dimension_numbers<[1], [0], [0], [1], [0, 0, 1, 1], [], []>} : vector<8x32xbf16>, vector<32x96xbf16>, vector<8x96xf32> -> vector<8x96xf32>
    %c0_19 = arith.constant 0 : index
    %c0_20 = arith.constant 0 : index
    %49 = vector.load %arg6[%c0_19, %c0_20] : memref<1x96xf32, #tpu.memory_space<vmem>>, vector<1x96xf32>
    %50 = vector.broadcast %49 : vector<1x96xf32> to vector<8x96xf32>
    %51 = arith.addf %48, %50 : vector<8x96xf32>
    %52 = vector.shape_cast %51 : vector<8x96xf32> to vector<1x8x96xf32>
    %53 = vector.shape_cast %52 : vector<1x8x96xf32> to vector<8x96xf32>
    %c0_21 = arith.constant 0 : index
    %c0_22 = arith.constant 0 : index
    %c0_23 = arith.constant 0 : index
    %54 = vector.load %arg2[%c0_21, %c0_22, %c0_23] : memref<1x1x8xf32, #tpu.memory_space<vmem>>, vector<1x1x8xf32>
    %55 = vector.shape_cast %54 : vector<1x1x8xf32> to vector<1x8xf32>
    %56 = tpu.transpose %53, [1, 0] : vector<8x96xf32> -> vector<96x8xf32>
    %57 = vector.shape_cast %56 : vector<96x8xf32> to vector<12x8x8xf32>
    %58 = vector.extract_strided_slice %57 {offsets = [0, 0, 0], sizes = [4, 8, 8], strides = [1, 1, 1]} : vector<12x8x8xf32> to vector<4x8x8xf32>
    %59 = arith.truncf %58 : vector<4x8x8xf32> to vector<4x8x8xbf16>
    %60 = vector.extract_strided_slice %57 {offsets = [4, 0, 0], sizes = [4, 8, 8], strides = [1, 1, 1]} : vector<12x8x8xf32> to vector<4x8x8xf32>
    %61 = arith.truncf %60 : vector<4x8x8xf32> to vector<4x8x8xbf16>
    %62 = vector.extract_strided_slice %57 {offsets = [8, 0, 0], sizes = [4, 8, 8], strides = [1, 1, 1]} : vector<12x8x8xf32> to vector<4x8x8xf32>
    %63 = arith.truncf %62 : vector<4x8x8xf32> to vector<4x8x8xbf16>
    "tpu.trace_start"() <{level = 10 : i32, message = "hdq,hdk->hqk"}> : () -> ()
    %cst_24 = arith.constant dense<0.000000e+00> : vector<4x8x8xf32>
    %64 = tpu.matmul %59, %61, %cst_24 {dimension_numbers = #tpu.dot_dimension_numbers<[1], [1], [2], [2], [0, 0, 0, 2, 1, 2], [0], [0]>} : vector<4x8x8xbf16>, vector<4x8x8xbf16>, vector<4x8x8xf32> -> vector<4x8x8xf32>
    %cst_25 = arith.constant 5.000000e-01 : f32
    "tpu.trace_stop"() : () -> ()
    %65 = vector.broadcast %cst_25 : f32 to vector<1x8xf32>
    %66 = arith.cmpf ogt, %55, %65 : vector<1x8xf32>
    %67 = vector.broadcast %66 : vector<1x8xi1> to vector<8x8xi1>
    %68 = arith.ori %18, %67 : vector<8x8xi1>
    %69 = vector.shape_cast %68 : vector<8x8xi1> to vector<1x8x8xi1>
    %70 = vector.broadcast %69 : vector<1x8x8xi1> to vector<4x8x8xi1>
    %71 = vector.shape_cast %21 : vector<8x8xf32> to vector<1x8x8xf32>
    %72 = vector.broadcast %71 : vector<1x8x8xf32> to vector<4x8x8xf32>
    %73 = arith.select %70, %72, %64 : vector<4x8x8xi1>, vector<4x8x8xf32>
    %cst_26 = arith.constant dense<0xFF800000> : vector<4x8xf32>
    %74 = vector.multi_reduction <maximumf>, %73, %cst_26 [2] : vector<4x8x8xf32> to vector<4x8xf32>
    %75 = vector.shape_cast %74 : vector<4x8xf32> to vector<4x8x1xf32>
    %76 = vector.broadcast %75 : vector<4x8x1xf32> to vector<4x8x8xf32>
    %77 = arith.subf %73, %76 : vector<4x8x8xf32>
    %78 = math.exp %77 : vector<4x8x8xf32>
    %cst_27 = arith.constant dense<0.000000e+00> : vector<4x8xf32>
    %79 = vector.multi_reduction <add>, %78, %cst_27 [2] : vector<4x8x8xf32> to vector<4x8xf32>
    %80 = vector.shape_cast %79 : vector<4x8xf32> to vector<4x8x1xf32>
    %81 = tpu.reciprocal %80 {approx = true} : vector<4x8x1xf32> -> vector<4x8x1xf32>
    %82 = vector.broadcast %81 : vector<4x8x1xf32> to vector<4x8x8xf32>
    %83 = arith.mulf %78, %82 : vector<4x8x8xf32>
    %84 = arith.truncf %83 : vector<4x8x8xf32> to vector<4x8x8xbf16>
    "tpu.trace_start"() <{level = 10 : i32, message = "hdk,hqk->hdq"}> : () -> ()
    %cst_28 = arith.constant dense<0.000000e+00> : vector<4x8x8xf32>
    %85 = tpu.matmul %63, %84, %cst_28 {dimension_numbers = #tpu.dot_dimension_numbers<[2], [2], [1], [1], [0, 0, 0, 1, 1, 1], [0], [0]>} : vector<4x8x8xbf16>, vector<4x8x8xbf16>, vector<4x8x8xf32> -> vector<4x8x8xf32>
    "tpu.trace_stop"() : () -> ()
    %cst_29 = arith.constant 1.000000e+00 : f32
    %86 = vector.broadcast %cst_29 : f32 to vector<1x8xf32>
    %87 = arith.subf %86, %55 : vector<1x8xf32>
    %88 = vector.shape_cast %87 : vector<1x8xf32> to vector<1x1x8xf32>
    %89 = vector.broadcast %88 : vector<1x1x8xf32> to vector<4x8x8xf32>
    %90 = arith.mulf %85, %89 : vector<4x8x8xf32>
    %91 = vector.shape_cast %90 : vector<4x8x8xf32> to vector<32x8xf32>
    %92 = tpu.transpose %91, [1, 0] : vector<32x8xf32> -> vector<8x32xf32>
    %c0_30 = arith.constant 0 : index
    %c0_31 = arith.constant 0 : index
    %c0_32 = arith.constant 0 : index
    %93 = vector.load %arg16[%c0_30, %c0_31, %c0_32] : memref<1x8x32xf32, #tpu.memory_space<vmem>>, vector<1x8x32xf32>
    %94 = vector.shape_cast %93 : vector<1x8x32xf32> to vector<8x32xf32>
    %95 = vector.shape_cast %92 : vector<8x32xf32> to vector<1x8x32xf32>
    tpu.vector_store %arg16[%c0_30, %c0_31, %c0_32], %95 {strides = array<i32>} : memref<1x8x32xf32, #tpu.memory_space<vmem>>, vector<1x8x32xf32>,
    %c0_33 = arith.constant 0 : index
    %c0_34 = arith.constant 0 : index
    %c0_35 = arith.constant 0 : index
    %96 = vector.load %arg16[%c0_33, %c0_34, %c0_35] : memref<1x8x32xf32, #tpu.memory_space<vmem>>, vector<1x8x32xf32>
    %97 = vector.shape_cast %96 : vector<1x8x32xf32> to vector<8x32xf32>
    %98 = arith.truncf %97 : vector<8x32xf32> to vector<8x32xbf16>
    %c0_36 = arith.constant 0 : index
    %c0_37 = arith.constant 0 : index
    %99 = vector.load %arg7[%c0_36, %c0_37] : memref<32x32xbf16, #tpu.memory_space<vmem>>, vector<32x32xbf16>
    %cst_38 = arith.constant dense<0.000000e+00> : vector<8x32xf32>
    %100 = tpu.matmul %98, %99, %cst_38 {dimension_numbers = #tpu.dot_dimension_numbers<[1], [0], [0], [1], [0, 0, 1, 1], [], []>} : vector<8x32xbf16>, vector<32x32xbf16>, vector<8x32xf32> -> vector<8x32xf32>
    %c0_39 = arith.constant 0 : index
    %c0_40 = arith.constant 0 : index
    %101 = vector.load %arg8[%c0_39, %c0_40] : memref<1x32xf32, #tpu.memory_space<vmem>>, vector<1x32xf32>
    %102 = vector.broadcast %101 : vector<1x32xf32> to vector<8x32xf32>
    %103 = arith.addf %100, %102 : vector<8x32xf32>
    %104 = arith.addf %1, %103 : vector<8x32xf32>
    %cst_41 = arith.constant dense<0.000000e+00> : vector<8xf32>
    %105 = vector.multi_reduction <add>, %104, %cst_41 [1] : vector<8x32xf32> to vector<8xf32>
    %106 = vector.shape_cast %105 : vector<8xf32> to vector<8x1xf32>
    %cst_42 = arith.constant 3.200000e+01 : f32
    %107 = vector.broadcast %cst_42 : f32 to vector<8x1xf32>
    %108 = arith.divf %106, %107 : vector<8x1xf32>
    %109 = vector.broadcast %108 : vector<8x1xf32> to vector<8x32xf32>
    %110 = arith.subf %104, %109 : vector<8x32xf32>
    %111 = arith.mulf %110, %110 : vector<8x32xf32>
    %cst_43 = arith.constant dense<0.000000e+00> : vector<8xf32>
    %112 = vector.multi_reduction <add>, %111, %cst_43 [1] : vector<8x32xf32> to vector<8xf32>
    %113 = vector.shape_cast %112 : vector<8xf32> to vector<8x1xf32>
    %cst_44 = arith.constant 3.200000e+01 : f32
    %114 = vector.broadcast %cst_44 : f32 to vector<8x1xf32>
    %115 = arith.divf %113, %114 : vector<8x1xf32>
    %116 = vector.broadcast %108 : vector<8x1xf32> to vector<8x32xf32>
    %117 = arith.subf %104, %116 : vector<8x32xf32>
    %cst_45 = arith.constant 9.99999974E-6 : f32
    %118 = vector.broadcast %cst_45 : f32 to vector<8x1xf32>
    %119 = arith.addf %115, %118 : vector<8x1xf32>
    %120 = math.rsqrt %119 : vector<8x1xf32>
    %121 = vector.broadcast %120 : vector<8x1xf32> to vector<8x32xf32>
    %122 = arith.mulf %117, %121 : vector<8x32xf32>
    %c0_46 = arith.constant 0 : index
    %c0_47 = arith.constant 0 : index
    %123 = vector.load %arg9[%c0_46, %c0_47] : memref<1x32xf32, #tpu.memory_space<vmem>>, vector<1x32xf32>
    %124 = vector.broadcast %123 : vector<1x32xf32> to vector<8x32xf32>
    %125 = arith.mulf %122, %124 : vector<8x32xf32>
    %c0_48 = arith.constant 0 : index
    %c0_49 = arith.constant 0 : index
    %126 = vector.load %arg10[%c0_48, %c0_49] : memref<1x32xf32, #tpu.memory_space<vmem>>, vector<1x32xf32>
    %127 = vector.broadcast %126 : vector<1x32xf32> to vector<8x32xf32>
    %128 = arith.addf %125, %127 : vector<8x32xf32>
    %129 = arith.truncf %128 : vector<8x32xf32> to vector<8x32xbf16>
    %c0_50 = arith.constant 0 : index
    %c0_51 = arith.constant 0 : index
    %130 = vector.load %arg11[%c0_50, %c0_51] : memref<32x128xbf16, #tpu.memory_space<vmem>>, vector<32x128xbf16>
    %cst_52 = arith.constant dense<0.000000e+00> : vector<8x128xf32>
    %131 = tpu.matmul %129, %130, %cst_52 {dimension_numbers = #tpu.dot_dimension_numbers<[1], [0], [0], [1], [0, 0, 1, 1], [], []>} : vector<8x32xbf16>, vector<32x128xbf16>, vector<8x128xf32> -> vector<8x128xf32>
    %c0_53 = arith.constant 0 : index
    %c0_54 = arith.constant 0 : index
    %132 = vector.load %arg12[%c0_53, %c0_54] : memref<1x128xf32, #tpu.memory_space<vmem>>, vector<1x128xf32>
    %133 = vector.broadcast %132 : vector<1x128xf32> to vector<8x128xf32>
    %134 = arith.addf %131, %133 : vector<8x128xf32>
    %cst_55 = arith.constant 0.000000e+00 : f32
    %135 = vector.broadcast %cst_55 : f32 to vector<8x128xf32>
    %136 = arith.maximumf %134, %135 : vector<8x128xf32>
    %137 = arith.truncf %136 : vector<8x128xf32> to vector<8x128xbf16>
    %c0_56 = arith.constant 0 : index
    %c0_57 = arith.constant 0 : index
    %138 = vector.load %arg13[%c0_56, %c0_57] : memref<128x32xbf16, #tpu.memory_space<vmem>>, vector<128x32xbf16>
    %cst_58 = arith.constant dense<0.000000e+00> : vector<8x32xf32>
    %139 = tpu.matmul %137, %138, %cst_58 {dimension_numbers = #tpu.dot_dimension_numbers<[1], [0], [0], [1], [0, 0, 1, 1], [], []>} : vector<8x128xbf16>, vector<128x32xbf16>, vector<8x32xf32> -> vector<8x32xf32>
    %c0_59 = arith.constant 0 : index
    %c0_60 = arith.constant 0 : index
    %140 = vector.load %arg14[%c0_59, %c0_60] : memref<1x32xf32, #tpu.memory_space<vmem>>, vector<1x32xf32>
    %141 = vector.broadcast %140 : vector<1x32xf32> to vector<8x32xf32>
    %142 = arith.addf %139, %141 : vector<8x32xf32>
    %143 = arith.addf %104, %142 : vector<8x32xf32>
    %144 = vector.shape_cast %143 : vector<8x32xf32> to vector<1x8x32xf32>
    %c0_61 = arith.constant 0 : index
    %c0_62 = arith.constant 0 : index
    %c0_63 = arith.constant 0 : index
    %145 = vector.load %arg15[%c0_61, %c0_62, %c0_63] : memref<1x8x32xf32, #tpu.memory_space<vmem>>, vector<1x8x32xf32>
    tpu.vector_store %arg15[%c0_61, %c0_62, %c0_63], %144 {strides = array<i32>} : memref<1x8x32xf32, #tpu.memory_space<vmem>>, vector<1x8x32xf32>,
    return
  }
  func.func @transform_0(%arg0: i32) -> (i32, i32, i32) {
    %c0_i32 = arith.constant 0 : i32
    %c0_i32_0 = arith.constant 0 : i32
    %c0_i32_1 = arith.constant 0 : i32
    return %arg0, %c0_i32, %c0_i32_0 : i32, i32, i32
  }
  func.func @transform_1(%arg0: i32) -> (i32, i32, i32) {
    %c0_i32 = arith.constant 0 : i32
    %c0_i32_0 = arith.constant 0 : i32
    %c0_i32_1 = arith.constant 0 : i32
    return %arg0, %c0_i32, %c0_i32_0 : i32, i32, i32
  }
  func.func @transform_2(%arg0: i32) -> (i32, i32) {
    %c0_i32 = arith.constant 0 : i32
    %c0_i32_0 = arith.constant 0 : i32
    %c0_i32_1 = arith.constant 0 : i32
    return %c0_i32, %c0_i32_0 : i32, i32
  }
  func.func @transform_3(%arg0: i32) -> (i32, i32) {
    %c0_i32 = arith.constant 0 : i32
    %c0_i32_0 = arith.constant 0 : i32
    %c0_i32_1 = arith.constant 0 : i32
    return %c0_i32, %c0_i32_0 : i32, i32
  }
  func.func @transform_4(%arg0: i32) -> (i32, i32) {
    %c0_i32 = arith.constant 0 : i32
    %c0_i32_0 = arith.constant 0 : i32
    %c0_i32_1 = arith.constant 0 : i32
    return %c0_i32, %c0_i32_0 : i32, i32
  }
  func.func @transform_5(%arg0: i32) -> (i32, i32) {
    %c0_i32 = arith.constant 0 : i32
    %c0_i32_0 = arith.constant 0 : i32
    %c0_i32_1 = arith.constant 0 : i32
    return %c0_i32, %c0_i32_0 : i32, i32
  }
  func.func @transform_6(%arg0: i32) -> (i32, i32) {
    %c0_i32 = arith.constant 0 : i32
    %c0_i32_0 = arith.constant 0 : i32
    %c0_i32_1 = arith.constant 0 : i32
    return %c0_i32, %c0_i32_0 : i32, i32
  }
  func.func @transform_7(%arg0: i32) -> (i32, i32) {
    %c0_i32 = arith.constant 0 : i32
    %c0_i32_0 = arith.constant 0 : i32
    %c0_i32_1 = arith.constant 0 : i32
    return %c0_i32, %c0_i32_0 : i32, i32
  }
  func.func @transform_8(%arg0: i32) -> (i32, i32) {
    %c0_i32 = arith.constant 0 : i32
    %c0_i32_0 = arith.constant 0 : i32
    %c0_i32_1 = arith.constant 0 : i32
    return %c0_i32, %c0_i32_0 : i32, i32
  }
  func.func @transform_9(%arg0: i32) -> (i32, i32) {
    %c0_i32 = arith.constant 0 : i32
    %c0_i32_0 = arith.constant 0 : i32
    %c0_i32_1 = arith.constant 0 : i32
    return %c0_i32, %c0_i32_0 : i32, i32
  }
  func.func @transform_10(%arg0: i32) -> (i32, i32) {
    %c0_i32 = arith.constant 0 : i32
    %c0_i32_0 = arith.constant 0 : i32
    %c0_i32_1 = arith.constant 0 : i32
    return %c0_i32, %c0_i32_0 : i32, i32
  }
  func.func @transform_11(%arg0: i32) -> (i32, i32) {
    %c0_i32 = arith.constant 0 : i32
    %c0_i32_0 = arith.constant 0 : i32
    %c0_i32_1 = arith.constant 0 : i32
    return %c0_i32, %c0_i32_0 : i32, i32
  }
  func.func @transform_12(%arg0: i32) -> (i32, i32) {
    %c0_i32 = arith.constant 0 : i32
    %c0_i32_0 = arith.constant 0 : i32
    %c0_i32_1 = arith.constant 0 : i32
    return %c0_i32, %c0_i32_0 : i32, i32
  }
  func.func @transform_13(%arg0: i32) -> (i32, i32) {
    %c0_i32 = arith.constant 0 : i32
    %c0_i32_0 = arith.constant 0 : i32
    %c0_i32_1 = arith.constant 0 : i32
    return %c0_i32, %c0_i32_0 : i32, i32
  }
  func.func @transform_14(%arg0: i32) -> (i32, i32, i32) {
    %c0_i32 = arith.constant 0 : i32
    %c0_i32_0 = arith.constant 0 : i32
    %c0_i32_1 = arith.constant 0 : i32
    return %arg0, %c0_i32, %c0_i32_0 : i32, i32, i32
  }
}

</mosaic_0001>

<bundles_post_ra>
// kernel: tpu_custom_call.1
= control target key start
LH: loop header
LB: loop body
LE: loop exit
PB: predicated region body
PF: predicated region fallthrough
CT: control target
= control target key end

     0   :  { %s1746_s0 = inlined_call_operand.vmem [shape: f32[2,8,32], index: 0, kind: input, shape index: {}]   ;;  %s1747_s1 = inlined_call_operand.vmem [shape: f32[2,1,8], index: 1, kind: input, shape index: {}]   ;;  %s1748_s2 = inlined_call_operand.vmem [shape: f32[1,32], index: 2, kind: input, shape index: {}]   ;;  %s1749_s3 = inlined_call_operand.vmem [shape: f32[1,32], index: 3, kind: input, shape index: {}]   ;;  %s1750_s4 = inlined_call_operand.vmem [shape: bf16[32,96], index: 4, kind: input, shape index: {}]   ;;  %s1751_s5 = inlined_call_operand.vmem [shape: f32[1,96], index: 5, kind: input, shape index: {}]   ;;  %s1752_s6 = inlined_call_operand.vmem [shape: bf16[32,32], index: 6, kind: input, shape index: {}]   ;;  %s1753_s7 = inlined_call_operand.vmem [shape: f32[1,32], index: 7, kind: input, shape index: {}]   ;;  %s1754_s8 = inlined_call_operand.vmem [shape: f32[1,32], index: 8, kind: input, shape index: {}]   ;;  %s1755_s9 = inlined_call_operand.vmem [shape: f32[1,32], index: 9, kind: input, shape index: {}]   ;;  %s1756_s10 = inlined_call_operand.vmem [shape: bf16[32,128], index: 10, kind: input, shape index: {}]   ;;  %s1757_s11 = inlined_call_operand.vmem [shape: f32[1,128], index: 11, kind: input, shape index: {}]   ;;  %s1758_s12 = inlined_call_operand.vmem [shape: bf16[128,32], index: 12, kind: input, shape index: {}]   ;;  %s1759_s13 = inlined_call_operand.vmem [shape: f32[1,32], index: 13, kind: input, shape index: {}]   ;;  %s1760_s14 = inlined_call_operand.hbm [shape: f32[2,8,32], index: 14, kind: output, shape index: {}]  }
   0x1   :  { %1761 = sst [smem:[#allocation6_spill]] %s1746_s0 }
   0x2   :  { %1762 = sst [smem:[#allocation7_spill]] %s1747_s1 }
   0x3   :  { %1763 = sst [smem:[#allocation8_spill]] %s1748_s2 }
   0x4   :  { %1764 = sst [smem:[#allocation9_spill]] %s1749_s3 }
   0x5   :  { %1765 = sst [smem:[#allocation10_spill]] %s1750_s4 }
   0x6   :  { %19 = vsyncpa [#allocation4], 0 }
   0x7   :  { %21 = vsyncpa [#allocation4 + $0x1], 0  ;;  %s1523_s29 = smov 0   ;;  %s1525_s30 = smov 0  }
   0x8   :  { %s1527_s15 = smov 0   ;;  %s1529_s16 = smov 0  }
   0x9 LB: > { %s1544_s17 = sadd.s32 4294967295, %s1442_s16   ;;  %s1212_s18 = sadd.s32 4294967294, %s1442_s16   ;;  %s1442_s16 = sphi %s1529_s16, %s1776_s16   ;;  %s1438_s15 = sphi %s1527_s15, %s1775_s15   ;;  %s1434_s30 = sphi %s1525_s30, %s1774_s30   ;;  %s1430_s29 = sphi %s1523_s29, %s1773_s29  }
   0xa   : > { %s1548_s19 = sadd.s32 1, %s1442_s16   ;;  %s338_s20 = sadd.s32 1, %s1438_s15 }
   0xb   : > { %s335_s21 = ssub.s32 %s1442_s16, %s1548_s19  ;;  %p348_p0 = scmp.ne.s32.totalorder %s1438_s15, %s1434_s30 }
   0xc   : > { %p336_p1 = scmp.eq.s32.totalorder %s335_s21, 0  ;;  %p349_p2 = scmp.eq.s32.totalorder %s1544_s17, 1 }
   0xd   : > { %p354_p3 = scmp.ne.s32.totalorder %s1434_s30, %s1430_s29  ;;  %p355_p4 = scmp.eq.s32.totalorder %s1212_s18, 1 }
   0xe   : > { %s1559_s22 = scalar_select %p336_p1, %s1438_s15, %s338_s20  }
   0xf   : > { %p1561_p5 = por %p349_p2, %p348_p0  ;;  %p1565_p6 = por %p355_p4, %p354_p3 }
  0x10   : > { %p1215_p7 = scmp.ge.s32.totalorder %s1442_s16, 1  ;;  %p422_p8 = scmp.lt.s32.totalorder %s1442_s16, 3 }
  0x12   : > { %p423_p9 = pnand %p1215_p7, %p422_p8 }
  0x13   : > { %p470_p10 = scmp.lt.s32.totalorder (!%p423_p9), %s1544_s17, 1  ;;  %s1768_s0 = sld [smem:[#allocation6_spill]] (!%p423_p9) }
  0x14   : > { %426 = sbr.rel (%p423_p9) target bundleno = 2184 (0x888), region = 76  ;;  %s1769_s4 = sld [smem:[#allocation10_spill]] (!%p423_p9) }
  0x15   : > { %s1770_s2 = sld [smem:[#allocation8_spill]] (!%p423_p9)  ;;  %s467_s21 = sand.u32 (!%p423_p9), 1, %s1434_s30  }
  0x16   : > { %s1771_s3 = sld [smem:[#allocation9_spill]] (!%p423_p9)  ;;  %s1286_s27 = sshll.u32 (!%p423_p9), %s1544_s17, 3 }
  0x17   : > { %s1772_s1 = sld [smem:[#allocation7_spill]] (!%p423_p9) }
  0x19   : > { %s1573_s25 = scalar_select %p470_p10, %s1544_s17, 1  ;;  %vm495_vm0 = vcmask 261120   ;;  %v1444_v2 = vmov 32.0   ;;  %v1352_v32 = vld [vmem:[%s1751_s5] ss:$0 sm:$0xff]  ;;  %vm637_vm5 = vcmask 1043456  }
  0x1a   : > { %1358 = vrcp.f32 %v1444_v2  ;;  %v1290_v14 = vld [vmem:[%s1769_s4 + $0x8] sm:$0xff]  ;;  %v1289_v15 = vld [vmem:[%s1769_s4] sm:$0xff]  ;;  %vm633_vm6 = vcmask 64512   ;;  %v479_v2 = vlaneseq  ;;  %vm1446_vm14 = vmmov 1   ;;  %s1129_s17 = scalar_lea.sflag [#allocation4], %s467_s21 }
  0x1b   : > { %s1217_s26 = sshll.u32 %s1573_s25, 3  ;;  %565 = vmatpush.bf16.msra.mxu0 %v1290_v14  ;;  %v1350_v25 = vld [vmem:[%s1770_s2] ss:$0 sm:$0xff]  ;;  %s1139_s2 = scalar_lea.hbm %s1760_s14, %s1286_s27 }
  0x1c   : > { %s473_s18 = scalar_lea.vmem %s1768_s0, %s1217_s26  ;;  %v1351_v28 = vld [vmem:[%s1771_s3] ss:$0 sm:$0xff]  ;;  %s1216_s26 = sshll.u32 %s467_s21, 3 }
  0x1d   : > { %v1579_v0 = vld [vmem:[%s473_s18] sm:$0xff]  ;;  %s476_s20 = scalar_lea.vmem %s1772_s1, %s1573_s25  ;;  %s1143_s3 = sshll.u32 %s1139_s2, 4  ;;  %s1144_s3 = int_to_ptr.hbm [resolvable:$true] %s1143_s3 }
  0x1e   : > { %v496_v1 = vsel %vm495_vm0, %v1579_v0, 0.0  ;;  %s1394_s4 = sshra.s32 %s1144_s3, 4  ;;  %s1395_s4 = int_to_ptr.hbm [resolvable:$true] %s1394_s4 }
  0x1f   : > { %497 = vadd.xlane.f32.xlu0 %v496_v1  ;;  %566 = vmatpush.bf16.msra.mxu0 %v1289_v15  ;;  %v1447_v15 = vmov -100.0   ;;  %s1396_s1 = scalar_lea.hbm %s1395_s4, 8  ;;  %p1401_p0 = scmp.lt.s32.totalorder %s1395_s4, %s1760_s14 }
  0x20   : > { %v1359_v3 = vpop.eup %1358  ;;  %p1397_p11 = scmp.ne.s32.totalorder %s1395_s4, %s1396_s1 }
  0x21   : > { %v500_v4 = vmul.f32 32.0, %v1359_v3  ;;  %vm504_vm1 = vweird.f32 %v1359_v3 }
  0x22   : > { %p1398_p12 = pnand %p1397_p11, %p1561_p5 }
  0x23   : > { %v501_v5 = vsub.f32 1.0, %v500_v4  ;;  %v482_v4 = vand.u32 127, %v479_v2 }
  0x24   : > { %p1399_p13 = pneg %p1398_p12 }
  0x25   : > { %v502_v6 = vmul.f32 %v1359_v3, %v501_v5  ;;  %vm489_vm11 = vcmp.eq.s32.totalorder %v482_v4, 0 }
  0x27   : > { %v503_v7 = vadd.f32 %v1359_v3, %v502_v6 }
  0x29   : > { %v1583_v8 = vsel %vm504_vm1, %v1359_v3, %v503_v7  ;;  %v480_v3 = vshrl.u32 %v479_v2, 7 }
  0x2b   : > { %v483_v5 = vsub.s32 %v482_v4, %v480_v3  ;;  %v485_v6 = vsub.s32 %v480_v3, %v482_v4  ;;  %vm488_vm10 = vcmp.eq.s32.totalorder %v480_v3, 0 }
  0x2c   : > { %vm490_vm13 = vmor %vm488_vm10, %vm489_vm11 }
  0x2d   : > { %vm484_vm8 = vcmp.le.s32.totalorder %v483_v5, 2  ;;  %vm486_vm9 = vcmp.le.s32.totalorder %v485_v6, 2  ;;  %vm492_vm1 = vmxor %vm490_vm13, %vm1446_vm14 }
  0x2e   : > { %vm487_vm12 = vmand %vm484_vm8, %vm486_vm9 }
  0x2f   : > { %vm491_vm15 = vmxor %vm487_vm12, %vm1446_vm14 }
  0x92   : > { %v498_v9 = vpop.xlane.xlu0 %497 }
  0x93   : > { %v506_v10 = vmul.f32 %v1583_v8, %v498_v9  ;;  %v1621_v9 = vld [vmem:[%s476_s20] sm:$0x1]  ;;  %s469_s20 = scalar_lea.vmem [#allocation3], %s1216_s26  ;;  %s1400_s26 = scalar_lea.hbm %s1760_s14, 16 }
  0x94   : > { %vm759_vm7 = vcmp.gt.f32.partialorder %v1621_v9, 0.5  ;;  %s1141_s25 = sshll.u32 %s469_s20, 4  ;;  %p1402_p1 = scmp.lt.s32.totalorder %s1400_s26, %s1396_s1  ;;  %s1142_s25 = int_to_ptr.vmem [resolvable:$true] %s1141_s25 }
  0x95   : > { %v507_v11 = vsub.f32 %v1579_v0, %v506_v10  ;;  %v1445_v10 = vmov 0  }
  0x96   : > { %p1403_p2 = por %p1402_p1, %p1401_p0 }
  0x97   : > { %v508_v12 = vmul.f32 %v507_v11, %v507_v11 }
  0x98   : > { %p1404_p3 = pnand %p1403_p2, %p1399_p13 }
  0x99   : > { %v509_v13 = vsel %vm495_vm0, %v508_v12, 0.0 }
  0x9a   : > { %510 = vadd.xlane.f32.xlu0 %v509_v13 }
 0x10d   : > { %v511_v16 = vpop.xlane.xlu0 %510 }
 0x10e   : > { %v512_v17 = vmul.f32 %v511_v16, %v1583_v8 }
 0x110   : > { %v513_v18 = vadd.f32 1e-05, %v512_v17 }
 0x112   : > { %1360 = vrsqrt.f32 %v513_v18  ;;  %vm520_vm3 = vweird.f32 %v513_v18 }
 0x118   : > { %v1361_v19 = vpop.eup %1360 }
 0x119   : > { %v515_v20 = vmul.f32 %v1361_v19, %v513_v18  ;;  %vm521_vm2 = vweird.f32 %v1361_v19 }
 0x11a   : > { %vm522_vm4 = vmor %vm520_vm3, %vm521_vm2 }
 0x11b   : > { %v516_v21 = vmul.f32 %v1361_v19, %v515_v20  ;;  %vm493_vm2 = vmand %vm491_vm15, %vm492_vm1 }
 0x11c   : > { %v494_v16 = vsel %vm493_vm2, -inf, %v1447_v15  ;;  %v894_v15 = vsub.f32 1.0, %v1621_v9  ;;  %v1292_v9 = vld [vmem:[%s1752_s6 + $0x8] sm:$0xff] }
 0x11d   : > { %v517_v22 = vmul.f32 0.5, %v516_v21 }
 0x11f   : > { %v518_v23 = vsub.f32 1.5, %v517_v22 }
 0x121   : > { %v519_v24 = vmul.f32 %v1361_v19, %v518_v23 }
 0x123   : > { %v523_v26 = vsel %vm522_vm4, %v1361_v19, %v519_v24 }
 0x124   : > { %v524_v27 = vmul.f32 %v523_v26, %v507_v11  ;;  %v760_v11 = vsel %vm759_vm7, 1, %v1445_v10 }
 0x125   : > { %v761_v12 = vperm.slane %v760_v11, 0 }
 0x126   : > { %v529_v29 = vmul.f32 %v1350_v25, %v524_v27 }
 0x127   : > { %vm762_vm3 = vcmp.eq.s32.totalorder %v761_v12, 1 }
 0x128   : > { %v534_v30 = vadd.f32 %v1351_v28, %v529_v29  ;;  %vm763_vm4 = vmor %vm493_vm2, %vm762_vm3 }
 0x129   : > { %v764_v14 = vsel %vm763_vm4, 1, %v1445_v10 }
 0x12a   : > { %v535_v31 = vpack.c.bf16 %v534_v30, %v534_v30 }
 0x12c   : > { %1226 = vmatmul.msk.bf16.vlgmr.msra.gmra.mxu0 %vm495_vm0, %v535_v31 }
 0x1a9   : > { %v568_v33 = vpop.f32.mrf.mxu0 }
 0x1aa   : > { %v569_v34 = vadd.f32 %v1352_v32, %v568_v33 }
 0x1ac   : > { %573 = vxpose.xlu1.b32.start.end [1/1] (short) (narrow) %v569_v34, 96 }
 0x1b1   : > { %v570_v35 = vpop.f32.mrf.mxu0 }
 0x250   : > { %v589_v36 = vpop.trf.xlu1 }
 0x251   : > { %v605_v37 = vpack.c.bf16 %v589_v36, %v589_v36 }
 0x253   : > { %617 = vxpose.xlu2.c.b16.start.end [1/1] (short) (narrow) %v605_v37, 16 }
 0x258   : > { %v590_v38 = vpop.trf.xlu1 }
 0x259   : > { %v606_v40 = vpack.c.bf16 %v590_v38, %v590_v38 }
 0x260   : > { %v591_v39 = vpop.trf.xlu1 }
 0x261   : > { %v607_v41 = vpack.c.bf16 %v591_v39, %v591_v39 }
 0x263   : > { %1347 = vxpose.binary.xlu1.c.b16.start.end [1/2] (short) (narrow) %v606_v40, %v607_v41, 16 }
 0x268   : > { %v592_v42 = vpop.trf.xlu1 }
 0x269   : > { %v608_v43 = vpack.c.bf16 %v592_v42, %v592_v42 }
 0x26b   : > { %724 = vxpose.xlu2.c.b16.start.end [1/1] (short) (narrow) %v608_v43, 16 }
 0x270   : > { %v593_v44 = vpop.trf.xlu1 }
 0x271   : > { %v609_v45 = vpack.c.bf16 %v593_v44, %v593_v44 }
 0x273   : > { %v639_v46 = vsel %vm637_vm5, %v609_v45, 0 }
 0x274   : > { %648 = vmatpush.bf16.msra.mxu1 %v639_v46 }
 0x278   : > { %v594_v47 = vpop.trf.xlu1 }
 0x279   : > { %v610_v48 = vpack.c.bf16 %v594_v47, %v594_v47 }
 0x27b   : > { %v674_v49 = vsel %vm637_vm5, %v610_v48, 0 }
 0x27c   : > { %683 = vmatpush.bf16.msra.mxu2 %v674_v49 }
 0x280   : > { %v595_v50 = vpop.trf.xlu1 }
 0x281   : > { %v611_v51 = vpack.c.bf16 %v595_v50, %v595_v50 }
 0x283   : > { %v709_v52 = vsel %vm637_vm5, %v611_v51, 0 }
 0x284   : > { %718 = vmatpush.bf16.msra.mxu3 %v709_v52 }
 0x288   : > { %v596_v53 = vpop.trf.xlu1 }
 0x289   : > { %v612_v54 = vpack.c.bf16 %v596_v53, %v596_v53 }
 0x28b   : > { %v744_v55 = vsel %vm637_vm5, %v612_v54, 0  ;;  %vm765_vm5 = vcmp.eq.s32.totalorder %v764_v14, 1 }
 0x28c   : > { %753 = vmatpush.bf16.msrb.mxu1 %v744_v55 }
 0x290   : > { %v1605_v56 = vpop.trf.xlu1 }
 0x298   : > { %v1607_v57 = vpop.trf.xlu1 }
 0x299   : > { %v614_v12 = vpack.c.bf16 %v1607_v57, %v1607_v57 }
 0x2a0   : > { %v1610_v59 = vpop.trf.xlu1 }
 0x2a1   : > { %v615_v6 = vpack.c.bf16 %v1610_v59, %v1610_v59 }
 0x2a8   : > { %v1612_v60 = vpop.trf.xlu1 }
 0x2a9   : > { %v616_v59 = vpack.c.bf16 %v1612_v60, %v1612_v60 }
 0x2f4   : > { %v625_v58 = vpop.trf.xlu2 }
 0x2f5   : > { %1227 = vmatmul.msk.bf16.vlgmr.msra.gmra.mxu1 %vm633_vm6, %v625_v58 }
 0x30c   : > { %v732_v61 = vpop.trf.xlu2 }
 0x30d   : > { %1230 = vmatmul.msk.bf16.vlgmr.msrb.gmra.mxu1 %vm633_vm6, %v732_v61 }
 0x30f   : > { %v1348_v62 = vpop.trf.xlu1 }
 0x310   : > { %1229 = vmatmul.msk.bf16.vlgmr.msra.gmra.mxu3 %vm633_vm6, %v1348_v62 }
 0x317   : > { %v1349_v63 = vpop.trf.xlu1 }
 0x318   : > { %1228 = vmatmul.msk.bf16.vlgmr.msra.gmra.mxu2 %vm633_vm6, %v1349_v63  ;;  %v613_v63 = vpack.c.bf16 %v1605_v56, %v1605_v56 }
 0x372   : > { %v650_v1 = vpop.f32.mrf.mxu1 }
 0x373   : > { %v766_v21 = vsel %vm765_vm5, %v494_v16, %v650_v1 }
 0x374   : > { %v770_v24 = vsel %vm633_vm6, %v766_v21, -inf }
 0x37a   : > { %v652_v7 = vpop.f32.mrf.mxu1 }
 0x38a   : > { %v755_v13 = vpop.f32.mrf.mxu1 }
 0x38b   : > { %v769_v27 = vsel %vm765_vm5, %v494_v16, %v755_v13 }
 0x38c   : > { %v779_v28 = vsel %vm633_vm6, %v769_v27, -inf }
 0x392   : > { %v757_v17 = vpop.f32.mrf.mxu1 }
 0x393   : > { %v720_v18 = vpop.f32.mrf.mxu3 }
 0x394   : > { %v768_v19 = vsel %vm765_vm5, %v494_v16, %v720_v18 }
 0x395   : > { %v776_v20 = vsel %vm633_vm6, %v768_v19, -inf }
 0x396   : > { %777 = vmax.xlane.f32.xlu0 %v776_v20 }
 0x39b   : > { %v685_v22 = vpop.f32.mrf.mxu2  ;;  %v722_v23 = vpop.f32.mrf.mxu3 }
 0x39c   : > { %v767_v25 = vsel %vm765_vm5, %v494_v16, %v685_v22  ;;  %v896_v16 = vperm.slane %v894_v15, 0 }
 0x39d   : > { %v773_v26 = vsel %vm633_vm6, %v767_v25, -inf }
 0x39e   : > { %771 = vmax.xlane.f32.xlu0 %v770_v24  ;;  %774 = vmax.xlane.f32.xlu2 %v773_v26 }
 0x3a3   : > { %v687_v29 = vpop.f32.mrf.mxu2 }
 0x3a6   : > { %780 = vmax.xlane.f32.xlu0 %v779_v28 }
 0x409   : > { %v778_v30 = vpop.xlane.xlu0 %777 }
 0x40a   : > { %v784_v33 = vsub.f32 %v768_v19, %v778_v30 }
 0x40c   : > { %v790_v35 = vmul.f32 1.442695, %v784_v33 }
 0x411   : > { %v772_v31 = vpop.xlane.xlu0 %771  ;;  %v775_v36 = vpop.xlane.xlu2 %774 }
 0x412   : > { %v782_v32 = vsub.f32 %v766_v21, %v772_v31  ;;  %v783_v38 = vsub.f32 %v767_v25, %v775_v36  ;;  %v1353_v31 = vld [vmem:[%s1753_s7] ss:$0 sm:$0xff] }
 0x414   : > { %v786_v34 = vmul.f32 1.442695, %v782_v32  ;;  %v788_v40 = vmul.f32 1.442695, %v783_v38 }
 0x416   : > { %1362 = vpow2.f32 %v786_v34 }
 0x417   : > { %1364 = vpow2.f32 %v790_v35 }
 0x418   : > { %1366 = vpow2.f32 %v788_v40 }
 0x419   : > { %v781_v41 = vpop.xlane.xlu0 %780 }
 0x41a   : > { %v785_v43 = vsub.f32 %v769_v27, %v781_v41  ;;  %v1291_v27 = vld [vmem:[%s1752_s6] sm:$0xff] }
 0x41c   : > { %v1363_v37 = vpop.eup %1362  ;;  %v792_v45 = vmul.f32 1.442695, %v785_v43  ;;  %v1302_v43 = vld [vmem:[%s1758_s12 + $0x38] sm:$0xff] }
 0x41d   : > { %v794_v39 = vsel %vm633_vm6, %v1363_v37, 0.0  ;;  %v1365_v42 = vpop.eup %1364  ;;  %1113 = vmatpush.bf16.msrb.mxu0 %v1302_v43 }
 0x41e   : > { %795 = vadd.xlane.f32.xlu0 %v794_v39  ;;  %v800_v44 = vsel %vm633_vm6, %v1365_v42, 0.0  ;;  %v1367_v46 = vpop.eup %1366  ;;  %1368 = vpow2.f32 %v792_v45 }
 0x41f   : > { %v797_v47 = vsel %vm633_vm6, %v1367_v46, 0.0 }
 0x424   : > { %v1369_v48 = vpop.eup %1368 }
 0x425   : > { %v803_v49 = vsel %vm633_vm6, %v1369_v48, 0.0 }
 0x426   : > { %801 = vadd.xlane.f32.xlu0 %v800_v44 }
 0x42e   : > { %798 = vadd.xlane.f32.xlu0 %v797_v47 }
 0x436   : > { %804 = vadd.xlane.f32.xlu0 %v803_v49  ;;  %v1299_v49 = vld [vmem:[%s1758_s12 + $0x20] sm:$0xff] }
 0x491   : > { %v796_v50 = vpop.xlane.xlu0 %795 }
 0x492   : > { %1370 = vrcp.f32 %v796_v50 }
 0x498   : > { %v1371_v51 = vpop.eup %1370 }
 0x499   : > { %v802_v52 = vpop.xlane.xlu0 %801  ;;  %v810_v53 = vmul.f32 %v1371_v51, %v1363_v37 }
 0x49a   : > { %1372 = vrcp.f32 %v802_v52 }
 0x49b   : > { %v814_v54 = vpack.c.bf16 %v810_v53, %v810_v53 }
 0x49d   : > { %v822_v55 = vsel %vm633_vm6, %v814_v54, 0  ;;  %v1297_v54 = vld [vmem:[%s1758_s12 + $0x10] sm:$0xff] }
 0x49e   : > { %831 = vmatpush.bf16.xpose.msrb.mxu2 %v822_v55 }
 0x4a0   : > { %v1373_v58 = vpop.eup %1372 }
 0x4a1   : > { %v799_v61 = vpop.xlane.xlu0 %798  ;;  %v812_v62 = vmul.f32 %v1373_v58, %v1365_v42  ;;  %v1294_v42 = vld [vmem:[%s1756_s10 + $0x8] sm:$0xff] }
 0x4a2   : > { %1374 = vrcp.f32 %v799_v61  ;;  %v1354_v61 = vld [vmem:[%s1754_s8] ss:$0 sm:$0xff] }
 0x4a3   : > { %v816_v1 = vpack.c.bf16 %v812_v62, %v812_v62 }
 0x4a5   : > { %1231 = vmatmul.msk.bf16.vlgmr.msrb.gmra.mxu2 %vm633_vm6, %v613_v63  ;;  %v860_v2 = vsel %vm633_vm6, %v816_v1, 0  ;;  %v1355_v1 = vld [vmem:[%s1755_s9] ss:$0 sm:$0xff] }
 0x4a6   : > { %869 = vmatpush.bf16.xpose.msra.mxu1 %v860_v2  ;;  %966 = vmatpush.bf16.msra.mxu2 %v1292_v9 }
 0x4a8   : > { %v1375_v3 = vpop.eup %1374 }
 0x4a9   : > { %v805_v4 = vpop.xlane.xlu0 %804  ;;  %v811_v5 = vmul.f32 %v1375_v3, %v1367_v46  ;;  %v1301_v46 = vld [vmem:[%s1758_s12 + $0x30] sm:$0xff] }
 0x4aa   : > { %1376 = vrcp.f32 %v805_v4  ;;  %967 = vmatpush.bf16.msra.mxu2 %v1291_v27  ;;  %1114 = vmatpush.bf16.msrb.mxu0 %v1301_v46 }
 0x4ab   : > { %v815_v7 = vpack.c.bf16 %v811_v5, %v811_v5  ;;  %v1296_v5 = vld [vmem:[%s1758_s12 + $0x8] sm:$0xff] }
 0x4ad   : > { %1233 = vmatmul.msk.bf16.vlgmr.msra.gmra.mxu1 %vm633_vm6, %v615_v6  ;;  %v841_v10 = vsel %vm633_vm6, %v815_v7, 0  ;;  %v1295_v6 = vld [vmem:[%s1758_s12] sm:$0xff] }
 0x4ae   : > { %850 = vmatpush.bf16.xpose.msrb.mxu3 %v841_v10  ;;  %v1356_v7 = vld [vmem:[%s1757_s11] ss:$0 sm:$0xff] }
 0x4b0   : > { %v1377_v56 = vpop.eup %1376 }
 0x4b1   : > { %v813_v11 = vmul.f32 %v1377_v56, %v1369_v48  ;;  %v1300_v48 = vld [vmem:[%s1758_s12 + $0x28] sm:$0xff] }
 0x4b2   : > { %1115 = vmatpush.bf16.msrb.mxu0 %v1300_v48 }
 0x4b3   : > { %v817_v13 = vpack.c.bf16 %v813_v11, %v813_v11 }
 0x4b5   : > { %1232 = vmatmul.msk.bf16.vlgmr.msrb.gmra.mxu3 %vm633_vm6, %v614_v12  ;;  %v879_v14 = vsel %vm633_vm6, %v817_v13, 0 }
 0x4b6   : > { %888 = vmatpush.bf16.xpose.msrb.mxu1 %v879_v14  ;;  %1036 = vmatpush.bf16.msra.mxu3 %v1294_v42  ;;  %v1357_v14 = vld [vmem:[%s1759_s13] ss:$0 sm:$0xff] }
 0x4b7   : > { %1116 = vmatpush.bf16.msrb.mxu0 %v1299_v49 }
 0x4bd   : > { %1234 = vmatmul.msk.bf16.vlgmr.msrb.gmra.mxu1 %vm633_vm6, %v616_v59 }
 0x528   : > { %v833_v17 = vpop.f32.mrf.mxu2 }
 0x529   : > { %v898_v18 = vmul.f32 %v896_v16, %v833_v17 }
 0x52a   : > { %v871_v19 = vpop.f32.mrf.mxu1 }
 0x52b   : > { %902 = vxpose.xlu0.b32.start [1/4] (short) (narrow) %v898_v18, 8  ;;  %v900_v25 = vmul.f32 %v896_v16, %v871_v19 }
 0x530   : > { %v835_v20 = vpop.f32.mrf.mxu2 }
 0x532   : > { %v873_v57 = vpop.f32.mrf.mxu1 }
 0x538   : > { %v852_v21 = vpop.f32.mrf.mxu3 }
 0x539   : > { %v899_v22 = vmul.f32 %v896_v16, %v852_v21 }
 0x53a   : > { %v890_v23 = vpop.f32.mrf.mxu1 }
 0x53b   : > { %903 = vxpose.xlu0.b32.cont [2/4] (short) (narrow) %v899_v22, 8  ;;  %v901_v60 = vmul.f32 %v896_v16, %v890_v23 }
 0x540   : > { %v854_v24 = vpop.f32.mrf.mxu3 }
 0x542   : > { %v892_v26 = vpop.f32.mrf.mxu1 }
 0x543   : > { %904 = vxpose.xlu0.b32.cont [3/4] (short) (narrow) %v900_v25, 8 }
 0x54b   : > { %905 = vxpose.xlu0.b32.end [4/4] (short) (narrow) %v901_v60, 8 }
 0x5d7   : > { %v918_v28 = vpop.trf.xlu0 }
 0x5d8   : > { %934 = vst.msk [vmem:[#allocation2] sm:$0xff] %vm495_vm0, %v918_v28 }
 0x5df   : > { %v935_v29 = vld [vmem:[#allocation2] sm:$0xff] }
 0x5e0   : > { %v936_v30 = vpack.c.bf16 %v935_v29, %v935_v29 }
 0x5e2   : > { %1243 = vmatmul.msk.bf16.vlgmr.msra.gmra.mxu2 %vm495_vm0, %v936_v30 }
 0x665   : > { %v969_v32 = vpop.f32.mrf.mxu2 }
 0x666   : > { %v970_v33 = vadd.f32 %v1353_v31, %v969_v32 }
 0x668   : > { %v1661_v34 = vadd.f32 %v970_v33, %v1579_v0  ;;  %v1293_v0 = vld [vmem:[%s1756_s10] sm:$0xff] }
 0x669   : > { %1037 = vmatpush.bf16.msra.mxu3 %v1293_v0 }
 0x66a   : > { %v974_v35 = vsel %vm495_vm0, %v1661_v34, 0.0 }
 0x66b   : > { %975 = vadd.xlane.f32.xlu1 %v974_v35 }
 0x66d   : > { %v971_v36 = vpop.f32.mrf.mxu2 }
 0x6de   : > { %v976_v37 = vpop.xlane.xlu1 %975 }
 0x6df   : > { %v977_v38 = vmul.f32 %v976_v37, %v1583_v8 }
 0x6e1   : > { %v978_v39 = vsub.f32 %v1661_v34, %v977_v38 }
 0x6e3   : > { %v979_v40 = vmul.f32 %v978_v39, %v978_v39 }
 0x6e5   : > { %v980_v41 = vsel %vm495_vm0, %v979_v40, 0.0 }
 0x6e6   : > { %981 = vadd.xlane.f32.xlu0 %v980_v41 }
 0x759   : > { %v982_v44 = vpop.xlane.xlu0 %981 }
 0x75a   : > { %v983_v45 = vmul.f32 %v982_v44, %v1583_v8  ;;  %v1298_v8 = vld [vmem:[%s1758_s12 + $0x18] sm:$0xff] }
 0x75b   : > { %1117 = vmatpush.bf16.msrb.mxu0 %v1298_v8 }
 0x75c   : > { %v984_v47 = vadd.f32 1e-05, %v983_v45 }
 0x75e   : > { %1378 = vrsqrt.f32 %v984_v47  ;;  %vm991_vm7 = vweird.f32 %v984_v47 }
 0x75f   : > { %1118 = vmatpush.bf16.msrb.mxu0 %v1297_v54 }
 0x763   : > { %1119 = vmatpush.bf16.msrb.mxu0 %v1296_v5 }
 0x764   : > { %v1379_v50 = vpop.eup %1378 }
 0x765   : > { %v986_v51 = vmul.f32 %v1379_v50, %v984_v47  ;;  %vm992_vm6 = vweird.f32 %v1379_v50 }
 0x766   : > { %vm993_vm8 = vmor %vm991_vm7, %vm992_vm6 }
 0x767   : > { %v987_v52 = vmul.f32 %v1379_v50, %v986_v51  ;;  %1120 = vmatpush.bf16.msrb.mxu0 %v1295_v6 }
 0x769   : > { %v988_v53 = vmul.f32 0.5, %v987_v52 }
 0x76b   : > { %v989_v55 = vsub.f32 1.5, %v988_v53 }
 0x76d   : > { %v990_v58 = vmul.f32 %v1379_v50, %v989_v55 }
 0x76f   : > { %v994_v62 = vsel %vm993_vm8, %v1379_v50, %v990_v58 }
 0x770   : > { %v995_v63 = vmul.f32 %v994_v62, %v978_v39 }
 0x772   : > { %v1000_v2 = vmul.f32 %v1354_v61, %v995_v63 }
 0x774   : > { %v1005_v3 = vadd.f32 %v1355_v1, %v1000_v2 }
 0x776   : > { %v1006_v4 = vpack.c.bf16 %v1005_v3, %v1005_v3 }
 0x778   : > { %1252 = vmatmul.msk.bf16.vlgmr.msra.gmra.mxu3 %vm495_vm0, %v1006_v4 }
 0x7fb   : > { %v1039_v10 = vpop.f32.mrf.mxu3 }
 0x7fc   : > { %v1040_v56 = vadd.f32 %v1356_v7, %v1039_v10 }
 0x7fe   : > { %v1043_v11 = vmax.f32 %v1040_v56, 0.0 }
 0x800   : > { %v1044_v12 = vpack.c.bf16 %v1043_v11, %v1043_v11 }
 0x802   : > { %1121 = vmatmul.bf16.vlgmr.msrb.gmra.mxu0 %v1044_v12 }
 0x803   : > { %v1041_v13 = vpop.f32.mrf.mxu3 }
 0x87f   : > { %v1122_v59 = vpop.f32.mrf.mxu0 }
 0x880   : > { %v1123_v15 = vadd.f32 %v1357_v14, %v1122_v59 }
 0x882   : > { %v1126_v16 = vadd.f32 %v1123_v15, %v1661_v34 }
 0x884   : > { %1127 = vst.msk [vmem:[%s469_s20] sm:$0xff] %vm495_vm0, %v1126_v16 }
 0x885   : > { %1407 = shalt.err (!%p1404_p3)
}
 0x886   : > { %1303 = dma.vmem_to_hbm [thread:$0]  (%p1561_p5), %s1142_s25, 128, %s1144_s3, %s1129_s17  }
 0x887   : > { %v1124_v17 = vpop.f32.mrf.mxu0 }
 0x888 PF: > { %p1309_p4 = scmp.ge.s32.totalorder %s1442_s16, 2  ;;  %s1155_s21 = sand.u32 1, %s1430_s29  }
 0x889   : > { %s1156_s18 = scalar_lea.sflag [#allocation4], %s1155_s21 }
 0x88a   : > { %p1306_p7 = pnand %p1309_p4, %p1565_p6 }
 0x88c   : > { %p1307_p8 = pneg %p1306_p7 }
 0x88e   : > { %1425 = dma.done.wait (%p1307_p8), %s1156_s18, 128  }
 0x88f   : > { %1427 = vsyncadd (%p1307_p8), %s1156_s18, 4294967168  ;;  %p24_p9 = scmp.ge.s32.totalorder %s1548_s19, 4   ;;  %s1773_s29 = smov %s1434_s30 }
 0x890   : > { %s1774_s30 = smov %s1438_s15  ;;  %s1775_s15 = smov %s1559_s22 }
 0x891   : > { %s1776_s16 = smov %s1548_s19  ;;  %26 = sbr.rel (!%p24_p9) target bundleno = 9 (0x9), region = 114 }
 0x896   :  { %1162 = vsyncpa [#allocation4], 1 }
 0x897   :  { %1164 = vsyncpa [#allocation4 + $0x1], 1 }

// kernel: tpu_custom_call.1
= control target key start
LH: loop header
LB: loop body
LE: loop exit
PB: predicated region body
PF: predicated region fallthrough
CT: control target
= control target key end

     0   :  { %s1746_s0 = inlined_call_operand.vmem [shape: f32[2,8,32], index: 0, kind: input, shape index: {}]   ;;  %s1747_s1 = inlined_call_operand.vmem [shape: f32[2,1,8], index: 1, kind: input, shape index: {}]   ;;  %s1748_s2 = inlined_call_operand.vmem [shape: f32[1,32], index: 2, kind: input, shape index: {}]   ;;  %s1749_s3 = inlined_call_operand.vmem [shape: f32[1,32], index: 3, kind: input, shape index: {}]   ;;  %s1750_s4 = inlined_call_operand.vmem [shape: bf16[32,96], index: 4, kind: input, shape index: {}]   ;;  %s1751_s5 = inlined_call_operand.vmem [shape: f32[1,96], index: 5, kind: input, shape index: {}]   ;;  %s1752_s6 = inlined_call_operand.vmem [shape: bf16[32,32], index: 6, kind: input, shape index: {}]   ;;  %s1753_s7 = inlined_call_operand.vmem [shape: f32[1,32], index: 7, kind: input, shape index: {}]   ;;  %s1754_s8 = inlined_call_operand.vmem [shape: f32[1,32], index: 8, kind: input, shape index: {}]   ;;  %s1755_s9 = inlined_call_operand.vmem [shape: f32[1,32], index: 9, kind: input, shape index: {}]   ;;  %s1756_s10 = inlined_call_operand.vmem [shape: bf16[32,128], index: 10, kind: input, shape index: {}]   ;;  %s1757_s11 = inlined_call_operand.vmem [shape: f32[1,128], index: 11, kind: input, shape index: {}]   ;;  %s1758_s12 = inlined_call_operand.vmem [shape: bf16[128,32], index: 12, kind: input, shape index: {}]   ;;  %s1759_s13 = inlined_call_operand.vmem [shape: f32[1,32], index: 13, kind: input, shape index: {}]   ;;  %s1760_s14 = inlined_call_operand.hbm [shape: f32[2,8,32], index: 14, kind: output, shape index: {}]  }
   0x1   :  { %1761 = sst [smem:[#allocation6_spill]] %s1746_s0 }
   0x2   :  { %1762 = sst [smem:[#allocation7_spill]] %s1747_s1 }
   0x3   :  { %1763 = sst [smem:[#allocation8_spill]] %s1748_s2 }
   0x4   :  { %1764 = sst [smem:[#allocation9_spill]] %s1749_s3 }
   0x5   :  { %1765 = sst [smem:[#allocation10_spill]] %s1750_s4 }
   0x6   :  { %19 = vsyncpa [#allocation4], 0 }
   0x7   :  { %21 = vsyncpa [#allocation4 + $0x1], 0  ;;  %s1523_s29 = smov 0   ;;  %s1525_s30 = smov 0  }
   0x8   :  { %s1527_s15 = smov 0   ;;  %s1529_s16 = smov 0  }
   0x9 LB: > { %s1544_s17 = sadd.s32 4294967295, %s1442_s16   ;;  %s1212_s18 = sadd.s32 4294967294, %s1442_s16   ;;  %s1442_s16 = sphi %s1529_s16, %s1776_s16   ;;  %s1438_s15 = sphi %s1527_s15, %s1775_s15   ;;  %s1434_s30 = sphi %s1525_s30, %s1774_s30   ;;  %s1430_s29 = sphi %s1523_s29, %s1773_s29  }
   0xa   : > { %s1548_s19 = sadd.s32 1, %s1442_s16   ;;  %s338_s20 = sadd.s32 1, %s1438_s15 }
   0xb   : > { %s335_s21 = ssub.s32 %s1442_s16, %s1548_s19  ;;  %p348_p0 = scmp.ne.s32.totalorder %s1438_s15, %s1434_s30 }
   0xc   : > { %p336_p1 = scmp.eq.s32.totalorder %s335_s21, 0  ;;  %p349_p2 = scmp.eq.s32.totalorder %s1544_s17, 1 }
   0xd   : > { %p354_p3 = scmp.ne.s32.totalorder %s1434_s30, %s1430_s29  ;;  %p355_p4 = scmp.eq.s32.totalorder %s1212_s18, 1 }
   0xe   : > { %s1559_s22 = scalar_select %p336_p1, %s1438_s15, %s338_s20  }
   0xf   : > { %p1561_p5 = por %p349_p2, %p348_p0  ;;  %p1565_p6 = por %p355_p4, %p354_p3 }
  0x10   : > { %p1215_p7 = scmp.ge.s32.totalorder %s1442_s16, 1  ;;  %p422_p8 = scmp.lt.s32.totalorder %s1442_s16, 3 }
  0x12   : > { %p423_p9 = pnand %p1215_p7, %p422_p8 }
  0x13   : > { %p470_p10 = scmp.lt.s32.totalorder (!%p423_p9), %s1544_s17, 1  ;;  %s1768_s0 = sld [smem:[#allocation6_spill]] (!%p423_p9) }
  0x14   : > { %426 = sbr.rel (%p423_p9) target bundleno = 2184 (0x888), region = 76  ;;  %s1769_s4 = sld [smem:[#allocation10_spill]] (!%p423_p9) }
  0x15   : > { %s1770_s2 = sld [smem:[#allocation8_spill]] (!%p423_p9)  ;;  %s467_s21 = sand.u32 (!%p423_p9), 1, %s1434_s30  }
  0x16   : > { %s1771_s3 = sld [smem:[#allocation9_spill]] (!%p423_p9)  ;;  %s1286_s27 = sshll.u32 (!%p423_p9), %s1544_s17, 3 }
  0x17   : > { %s1772_s1 = sld [smem:[#allocation7_spill]] (!%p423_p9) }
  0x19   : > { %s1573_s25 = scalar_select %p470_p10, %s1544_s17, 1  ;;  %vm495_vm0 = vcmask 261120   ;;  %v1444_v2 = vmov 32.0   ;;  %v1352_v32 = vld [vmem:[%s1751_s5] ss:$0 sm:$0xff]  ;;  %vm637_vm5 = vcmask 1043456  }
  0x1a   : > { %1358 = vrcp.f32 %v1444_v2  ;;  %v1290_v14 = vld [vmem:[%s1769_s4 + $0x8] sm:$0xff]  ;;  %v1289_v15 = vld [vmem:[%s1769_s4] sm:$0xff]  ;;  %vm633_vm6 = vcmask 64512   ;;  %v479_v2 = vlaneseq  ;;  %vm1446_vm14 = vmmov 1   ;;  %s1129_s17 = scalar_lea.sflag [#allocation4], %s467_s21 }
  0x1b   : > { %s1217_s26 = sshll.u32 %s1573_s25, 3  ;;  %565 = vmatpush.bf16.msra.mxu0 %v1290_v14  ;;  %v1350_v25 = vld [vmem:[%s1770_s2] ss:$0 sm:$0xff]  ;;  %s1139_s2 = scalar_lea.hbm %s1760_s14, %s1286_s27 }
  0x1c   : > { %s473_s18 = scalar_lea.vmem %s1768_s0, %s1217_s26  ;;  %v1351_v28 = vld [vmem:[%s1771_s3] ss:$0 sm:$0xff]  ;;  %s1216_s26 = sshll.u32 %s467_s21, 3 }
  0x1d   : > { %v1579_v0 = vld [vmem:[%s473_s18] sm:$0xff]  ;;  %s476_s20 = scalar_lea.vmem %s1772_s1, %s1573_s25  ;;  %s1143_s3 = sshll.u32 %s1139_s2, 4  ;;  %s1144_s3 = int_to_ptr.hbm [resolvable:$true] %s1143_s3 }
  0x1e   : > { %v496_v1 = vsel %vm495_vm0, %v1579_v0, 0.0  ;;  %s1394_s4 = sshra.s32 %s1144_s3, 4  ;;  %s1395_s4 = int_to_ptr.hbm [resolvable:$true] %s1394_s4 }
  0x1f   : > { %497 = vadd.xlane.f32.xlu0 %v496_v1  ;;  %566 = vmatpush.bf16.msra.mxu0 %v1289_v15  ;;  %v1447_v15 = vmov -100.0   ;;  %s1396_s1 = scalar_lea.hbm %s1395_s4, 8  ;;  %p1401_p0 = scmp.lt.s32.totalorder %s1395_s4, %s1760_s14 }
  0x20   : > { %v1359_v3 = vpop.eup %1358  ;;  %p1397_p11 = scmp.ne.s32.totalorder %s1395_s4, %s1396_s1 }
  0x21   : > { %v500_v4 = vmul.f32 32.0, %v1359_v3  ;;  %vm504_vm1 = vweird.f32 %v1359_v3 }
  0x22   : > { %p1398_p12 = pnand %p1397_p11, %p1561_p5 }
  0x23   : > { %v501_v5 = vsub.f32 1.0, %v500_v4  ;;  %v482_v4 = vand.u32 127, %v479_v2 }
  0x24   : > { %p1399_p13 = pneg %p1398_p12 }
  0x25   : > { %v502_v6 = vmul.f32 %v1359_v3, %v501_v5  ;;  %vm489_vm11 = vcmp.eq.s32.totalorder %v482_v4, 0 }
  0x27   : > { %v503_v7 = vadd.f32 %v1359_v3, %v502_v6 }
  0x29   : > { %v1583_v8 = vsel %vm504_vm1, %v1359_v3, %v503_v7  ;;  %v480_v3 = vshrl.u32 %v479_v2, 7 }
  0x2b   : > { %v483_v5 = vsub.s32 %v482_v4, %v480_v3  ;;  %v485_v6 = vsub.s32 %v480_v3, %v482_v4  ;;  %vm488_vm10 = vcmp.eq.s32.totalorder %v480_v3, 0 }
  0x2c   : > { %vm490_vm13 = vmor %vm488_vm10, %vm489_vm11 }
  0x2d   : > { %vm484_vm8 = vcmp.le.s32.totalorder %v483_v5, 2  ;;  %vm486_vm9 = vcmp.le.s32.totalorder %v485_v6, 2  ;;  %vm492_vm1 = vmxor %vm490_vm13, %vm1446_vm14 }
  0x2e   : > { %vm487_vm12 = vmand %vm484_vm8, %vm486_vm9 }
  0x2f   : > { %vm491_vm15 = vmxor %vm487_vm12, %vm1446_vm14 }
  0x92   : > { %v498_v9 = vpop.xlane.xlu0 %497 }
  0x93   : > { %v506_v10 = vmul.f32 %v1583_v8, %v498_v9  ;;  %v1621_v9 = vld [vmem:[%s476_s20] sm:$0x1]  ;;  %s469_s20 = scalar_lea.vmem [#allocation3], %s1216_s26  ;;  %s1400_s26 = scalar_lea.hbm %s1760_s14, 16 }
  0x94   : > { %vm759_vm7 = vcmp.gt.f32.partialorder %v1621_v9, 0.5  ;;  %s1141_s25 = sshll.u32 %s469_s20, 4  ;;  %p1402_p1 = scmp.lt.s32.totalorder %s1400_s26, %s1396_s1  ;;  %s1142_s25 = int_to_ptr.vmem [resolvable:$true] %s1141_s25 }
  0x95   : > { %v507_v11 = vsub.f32 %v1579_v0, %v506_v10  ;;  %v1445_v10 = vmov 0  }
  0x96   : > { %p1403_p2 = por %p1402_p1, %p1401_p0 }
  0x97   : > { %v508_v12 = vmul.f32 %v507_v11, %v507_v11 }
  0x98   : > { %p1404_p3 = pnand %p1403_p2, %p1399_p13 }
  0x99   : > { %v509_v13 = vsel %vm495_vm0, %v508_v12, 0.0 }
  0x9a   : > { %510 = vadd.xlane.f32.xlu0 %v509_v13 }
 0x10d   : > { %v511_v16 = vpop.xlane.xlu0 %510 }
 0x10e   : > { %v512_v17 = vmul.f32 %v511_v16, %v1583_v8 }
 0x110   : > { %v513_v18 = vadd.f32 1e-05, %v512_v17 }
 0x112   : > { %1360 = vrsqrt.f32 %v513_v18  ;;  %vm520_vm3 = vweird.f32 %v513_v18 }
 0x118   : > { %v1361_v19 = vpop.eup %1360 }
 0x119   : > { %v515_v20 = vmul.f32 %v1361_v19, %v513_v18  ;;  %vm521_vm2 = vweird.f32 %v1361_v19 }
 0x11a   : > { %vm522_vm4 = vmor %vm520_vm3, %vm521_vm2 }
 0x11b   : > { %v516_v21 = vmul.f32 %v1361_v19, %v515_v20  ;;  %vm493_vm2 = vmand %vm491_vm15, %vm492_vm1 }
 0x11c   : > { %v494_v16 = vsel %vm493_vm2, -inf, %v1447_v15  ;;  %v894_v15 = vsub.f32 1.0, %v1621_v9  ;;  %v1292_v9 = vld [vmem:[%s1752_s6 + $0x8] sm:$0xff] }
 0x11d   : > { %v517_v22 = vmul.f32 0.5, %v516_v21 }
 0x11f   : > { %v518_v23 = vsub.f32 1.5, %v517_v22 }
 0x121   : > { %v519_v24 = vmul.f32 %v1361_v19, %v518_v23 }
 0x123   : > { %v523_v26 = vsel %vm522_vm4, %v1361_v19, %v519_v24 }
 0x124   : > { %v524_v27 = vmul.f32 %v523_v26, %v507_v11  ;;  %v760_v11 = vsel %vm759_vm7, 1, %v1445_v10 }
 0x125   : > { %v761_v12 = vperm.slane %v760_v11, 0 }
 0x126   : > { %v529_v29 = vmul.f32 %v1350_v25, %v524_v27 }
 0x127   : > { %vm762_vm3 = vcmp.eq.s32.totalorder %v761_v12, 1 }
 0x128   : > { %v534_v30 = vadd.f32 %v1351_v28, %v529_v29  ;;  %vm763_vm4 = vmor %vm493_vm2, %vm762_vm3 }
 0x129   : > { %v764_v14 = vsel %vm763_vm4, 1, %v1445_v10 }
 0x12a   : > { %v535_v31 = vpack.c.bf16 %v534_v30, %v534_v30 }
 0x12c   : > { %1226 = vmatmul.msk.bf16.vlgmr.msra.gmra.mxu0 %vm495_vm0, %v535_v31 }
 0x1a9   : > { %v568_v33 = vpop.f32.mrf.mxu0 }
 0x1aa   : > { %v569_v34 = vadd.f32 %v1352_v32, %v568_v33 }
 0x1ac   : > { %573 = vxpose.xlu1.b32.start.end [1/1] (short) (narrow) %v569_v34, 96 }
 0x1b1   : > { %v570_v35 = vpop.f32.mrf.mxu0 }
 0x250   : > { %v589_v36 = vpop.trf.xlu1 }
 0x251   : > { %v605_v37 = vpack.c.bf16 %v589_v36, %v589_v36 }
 0x253   : > { %617 = vxpose.xlu2.c.b16.start.end [1/1] (short) (narrow) %v605_v37, 16 }
 0x258   : > { %v590_v38 = vpop.trf.xlu1 }
 0x259   : > { %v606_v40 = vpack.c.bf16 %v590_v38, %v590_v38 }
 0x260   : > { %v591_v39 = vpop.trf.xlu1 }
 0x261   : > { %v607_v41 = vpack.c.bf16 %v591_v39, %v591_v39 }
 0x263   : > { %1347 = vxpose.binary.xlu1.c.b16.start.end [1/2] (short) (narrow) %v606_v40, %v607_v41, 16 }
 0x268   : > { %v592_v42 = vpop.trf.xlu1 }
 0x269   : > { %v608_v43 = vpack.c.bf16 %v592_v42, %v592_v42 }
 0x26b   : > { %724 = vxpose.xlu2.c.b16.start.end [1/1] (short) (narrow) %v608_v43, 16 }
 0x270   : > { %v593_v44 = vpop.trf.xlu1 }
 0x271   : > { %v609_v45 = vpack.c.bf16 %v593_v44, %v593_v44 }
 0x273   : > { %v639_v46 = vsel %vm637_vm5, %v609_v45, 0 }
 0x274   : > { %648 = vmatpush.bf16.msra.mxu1 %v639_v46 }
 0x278   : > { %v594_v47 = vpop.trf.xlu1 }
 0x279   : > { %v610_v48 = vpack.c.bf16 %v594_v47, %v594_v47 }
 0x27b   : > { %v674_v49 = vsel %vm637_vm5, %v610_v48, 0 }
 0x27c   : > { %683 = vmatpush.bf16.msra.mxu2 %v674_v49 }
 0x280   : > { %v595_v50 = vpop.trf.xlu1 }
 0x281   : > { %v611_v51 = vpack.c.bf16 %v595_v50, %v595_v50 }
 0x283   : > { %v709_v52 = vsel %vm637_vm5, %v611_v51, 0 }
 0x284   : > { %718 = vmatpush.bf16.msra.mxu3 %v709_v52 }
 0x288   : > { %v596_v53 = vpop.trf.xlu1 }
 0x289   : > { %v612_v54 = vpack.c.bf16 %v596_v53, %v596_v53 }
 0x28b   : > { %v744_v55 = vsel %vm637_vm5, %v612_v54, 0  ;;  %vm765_vm5 = vcmp.eq.s32.totalorder %v764_v14, 1 }
 0x28c   : > { %753 = vmatpush.bf16.msrb.mxu1 %v744_v55 }
 0x290   : > { %v1605_v56 = vpop.trf.xlu1 }
 0x298   : > { %v1607_v57 = vpop.trf.xlu1 }
 0x299   : > { %v614_v12 = vpack.c.bf16 %v1607_v57, %v1607_v57 }
 0x2a0   : > { %v1610_v59 = vpop.trf.xlu1 }
 0x2a1   : > { %v615_v6 = vpack.c.bf16 %v1610_v59, %v1610_v59 }
 0x2a8   : > { %v1612_v60 = vpop.trf.xlu1 }
 0x2a9   : > { %v616_v59 = vpack.c.bf16 %v1612_v60, %v1612_v60 }
 0x2f4   : > { %v625_v58 = vpop.trf.xlu2 }
 0x2f5   : > { %1227 = vmatmul.msk.bf16.vlgmr.msra.gmra.mxu1 %vm633_vm6, %v625_v58 }
 0x30c   : > { %v732_v61 = vpop.trf.xlu2 }
 0x30d   : > { %1230 = vmatmul.msk.bf16.vlgmr.msrb.gmra.mxu1 %vm633_vm6, %v732_v61 }
 0x30f   : > { %v1348_v62 = vpop.trf.xlu1 }
 0x310   : > { %1229 = vmatmul.msk.bf16.vlgmr.msra.gmra.mxu3 %vm633_vm6, %v1348_v62 }
 0x317   : > { %v1349_v63 = vpop.trf.xlu1 }
 0x318   : > { %1228 = vmatmul.msk.bf16.vlgmr.msra.gmra.mxu2 %vm633_vm6, %v1349_v63  ;;  %v613_v63 = vpack.c.bf16 %v1605_v56, %v1605_v56 }
 0x372   : > { %v650_v1 = vpop.f32.mrf.mxu1 }
 0x373   : > { %v766_v21 = vsel %vm765_vm5, %v494_v16, %v650_v1 }
 0x374   : > { %v770_v24 = vsel %vm633_vm6, %v766_v21, -inf }
 0x37a   : > { %v652_v7 = vpop.f32.mrf.mxu1 }
 0x38a   : > { %v755_v13 = vpop.f32.mrf.mxu1 }
 0x38b   : > { %v769_v27 = vsel %vm765_vm5, %v494_v16, %v755_v13 }
 0x38c   : > { %v779_v28 = vsel %vm633_vm6, %v769_v27, -inf }
 0x392   : > { %v757_v17 = vpop.f32.mrf.mxu1 }
 0x393   : > { %v720_v18 = vpop.f32.mrf.mxu3 }
 0x394   : > { %v768_v19 = vsel %vm765_vm5, %v494_v16, %v720_v18 }
 0x395   : > { %v776_v20 = vsel %vm633_vm6, %v768_v19, -inf }
 0x396   : > { %777 = vmax.xlane.f32.xlu0 %v776_v20 }
 0x39b   : > { %v685_v22 = vpop.f32.mrf.mxu2  ;;  %v722_v23 = vpop.f32.mrf.mxu3 }
 0x39c   : > { %v767_v25 = vsel %vm765_vm5, %v494_v16, %v685_v22  ;;  %v896_v16 = vperm.slane %v894_v15, 0 }
 0x39d   : > { %v773_v26 = vsel %vm633_vm6, %v767_v25, -inf }
 0x39e   : > { %771 = vmax.xlane.f32.xlu0 %v770_v24  ;;  %774 = vmax.xlane.f32.xlu2 %v773_v26 }
 0x3a3   : > { %v687_v29 = vpop.f32.mrf.mxu2 }
 0x3a6   : > { %780 = vmax.xlane.f32.xlu0 %v779_v28 }
 0x409   : > { %v778_v30 = vpop.xlane.xlu0 %777 }
 0x40a   : > { %v784_v33 = vsub.f32 %v768_v19, %v778_v30 }
 0x40c   : > { %v790_v35 = vmul.f32 1.442695, %v784_v33 }
 0x411   : > { %v772_v31 = vpop.xlane.xlu0 %771  ;;  %v775_v36 = vpop.xlane.xlu2 %774 }
 0x412   : > { %v782_v32 = vsub.f32 %v766_v21, %v772_v31  ;;  %v783_v38 = vsub.f32 %v767_v25, %v775_v36  ;;  %v1353_v31 = vld [vmem:[%s1753_s7] ss:$0 sm:$0xff] }
 0x414   : > { %v786_v34 = vmul.f32 1.442695, %v782_v32  ;;  %v788_v40 = vmul.f32 1.442695, %v783_v38 }
 0x416   : > { %1362 = vpow2.f32 %v786_v34 }
 0x417   : > { %1364 = vpow2.f32 %v790_v35 }
 0x418   : > { %1366 = vpow2.f32 %v788_v40 }
 0x419   : > { %v781_v41 = vpop.xlane.xlu0 %780 }
 0x41a   : > { %v785_v43 = vsub.f32 %v769_v27, %v781_v41  ;;  %v1291_v27 = vld [vmem:[%s1752_s6] sm:$0xff] }
 0x41c   : > { %v1363_v37 = vpop.eup %1362  ;;  %v792_v45 = vmul.f32 1.442695, %v785_v43  ;;  %v1302_v43 = vld [vmem:[%s1758_s12 + $0x38] sm:$0xff] }
 0x41d   : > { %v794_v39 = vsel %vm633_vm6, %v1363_v37, 0.0  ;;  %v1365_v42 = vpop.eup %1364  ;;  %1113 = vmatpush.bf16.msrb.mxu0 %v1302_v43 }
 0x41e   : > { %795 = vadd.xlane.f32.xlu0 %v794_v39  ;;  %v800_v44 = vsel %vm633_vm6, %v1365_v42, 0.0  ;;  %v1367_v46 = vpop.eup %1366  ;;  %1368 = vpow2.f32 %v792_v45 }
 0x41f   : > { %v797_v47 = vsel %vm633_vm6, %v1367_v46, 0.0 }
 0x424   : > { %v1369_v48 = vpop.eup %1368 }
 0x425   : > { %v803_v49 = vsel %vm633_vm6, %v1369_v48, 0.0 }
 0x426   : > { %801 = vadd.xlane.f32.xlu0 %v800_v44 }
 0x42e   : > { %798 = vadd.xlane.f32.xlu0 %v797_v47 }
 0x436   : > { %804 = vadd.xlane.f32.xlu0 %v803_v49  ;;  %v1299_v49 = vld [vmem:[%s1758_s12 + $0x20] sm:$0xff] }
 0x491   : > { %v796_v50 = vpop.xlane.xlu0 %795 }
 0x492   : > { %1370 = vrcp.f32 %v796_v50 }
 0x498   : > { %v1371_v51 = vpop.eup %1370 }
 0x499   : > { %v802_v52 = vpop.xlane.xlu0 %801  ;;  %v810_v53 = vmul.f32 %v1371_v51, %v1363_v37 }
 0x49a   : > { %1372 = vrcp.f32 %v802_v52 }
 0x49b   : > { %v814_v54 = vpack.c.bf16 %v810_v53, %v810_v53 }
 0x49d   : > { %v822_v55 = vsel %vm633_vm6, %v814_v54, 0  ;;  %v1297_v54 = vld [vmem:[%s1758_s12 + $0x10] sm:$0xff] }
 0x49e   : > { %831 = vmatpush.bf16.xpose.msrb.mxu2 %v822_v55 }
 0x4a0   : > { %v1373_v58 = vpop.eup %1372 }
 0x4a1   : > { %v799_v61 = vpop.xlane.xlu0 %798  ;;  %v812_v62 = vmul.f32 %v1373_v58, %v1365_v42  ;;  %v1294_v42 = vld [vmem:[%s1756_s10 + $0x8] sm:$0xff] }
 0x4a2   : > { %1374 = vrcp.f32 %v799_v61  ;;  %v1354_v61 = vld [vmem:[%s1754_s8] ss:$0 sm:$0xff] }
 0x4a3   : > { %v816_v1 = vpack.c.bf16 %v812_v62, %v812_v62 }
 0x4a5   : > { %1231 = vmatmul.msk.bf16.vlgmr.msrb.gmra.mxu2 %vm633_vm6, %v613_v63  ;;  %v860_v2 = vsel %vm633_vm6, %v816_v1, 0  ;;  %v1355_v1 = vld [vmem:[%s1755_s9] ss:$0 sm:$0xff] }
 0x4a6   : > { %869 = vmatpush.bf16.xpose.msra.mxu1 %v860_v2  ;;  %966 = vmatpush.bf16.msra.mxu2 %v1292_v9 }
 0x4a8   : > { %v1375_v3 = vpop.eup %1374 }
 0x4a9   : > { %v805_v4 = vpop.xlane.xlu0 %804  ;;  %v811_v5 = vmul.f32 %v1375_v3, %v1367_v46  ;;  %v1301_v46 = vld [vmem:[%s1758_s12 + $0x30] sm:$0xff] }
 0x4aa   : > { %1376 = vrcp.f32 %v805_v4  ;;  %967 = vmatpush.bf16.msra.mxu2 %v1291_v27  ;;  %1114 = vmatpush.bf16.msrb.mxu0 %v1301_v46 }
 0x4ab   : > { %v815_v7 = vpack.c.bf16 %v811_v5, %v811_v5  ;;  %v1296_v5 = vld [vmem:[%s1758_s12 + $0x8] sm:$0xff] }
 0x4ad   : > { %1233 = vmatmul.msk.bf16.vlgmr.msra.gmra.mxu1 %vm633_vm6, %v615_v6  ;;  %v841_v10 = vsel %vm633_vm6, %v815_v7, 0  ;;  %v1295_v6 = vld [vmem:[%s1758_s12] sm:$0xff] }
 0x4ae   : > { %850 = vmatpush.bf16.xpose.msrb.mxu3 %v841_v10  ;;  %v1356_v7 = vld [vmem:[%s1757_s11] ss:$0 sm:$0xff] }
 0x4b0   : > { %v1377_v56 = vpop.eup %1376 }
 0x4b1   : > { %v813_v11 = vmul.f32 %v1377_v56, %v1369_v48  ;;  %v1300_v48 = vld [vmem:[%s1758_s12 + $0x28] sm:$0xff] }
 0x4b2   : > { %1115 = vmatpush.bf16.msrb.mxu0 %v1300_v48 }
 0x4b3   : > { %v817_v13 = vpack.c.bf16 %v813_v11, %v813_v11 }
 0x4b5   : > { %1232 = vmatmul.msk.bf16.vlgmr.msrb.gmra.mxu3 %vm633_vm6, %v614_v12  ;;  %v879_v14 = vsel %vm633_vm6, %v817_v13, 0 }
 0x4b6   : > { %888 = vmatpush.bf16.xpose.msrb.mxu1 %v879_v14  ;;  %1036 = vmatpush.bf16.msra.mxu3 %v1294_v42  ;;  %v1357_v14 = vld [vmem:[%s1759_s13] ss:$0 sm:$0xff] }
 0x4b7   : > { %1116 = vmatpush.bf16.msrb.mxu0 %v1299_v49 }
 0x4bd   : > { %1234 = vmatmul.msk.bf16.vlgmr.msrb.gmra.mxu1 %vm633_vm6, %v616_v59 }
 0x528   : > { %v833_v17 = vpop.f32.mrf.mxu2 }
 0x529   : > { %v898_v18 = vmul.f32 %v896_v16, %v833_v17 }
 0x52a   : > { %v871_v19 = vpop.f32.mrf.mxu1 }
 0x52b   : > { %902 = vxpose.xlu0.b32.start [1/4] (short) (narrow) %v898_v18, 8  ;;  %v900_v25 = vmul.f32 %v896_v16, %v871_v19 }
 0x530   : > { %v835_v20 = vpop.f32.mrf.mxu2 }
 0x532   : > { %v873_v57 = vpop.f32.mrf.mxu1 }
 0x538   : > { %v852_v21 = vpop.f32.mrf.mxu3 }
 0x539   : > { %v899_v22 = vmul.f32 %v896_v16, %v852_v21 }
 0x53a   : > { %v890_v23 = vpop.f32.mrf.mxu1 }
 0x53b   : > { %903 = vxpose.xlu0.b32.cont [2/4] (short) (narrow) %v899_v22, 8  ;;  %v901_v60 = vmul.f32 %v896_v16, %v890_v23 }
 0x540   : > { %v854_v24 = vpop.f32.mrf.mxu3 }
 0x542   : > { %v892_v26 = vpop.f32.mrf.mxu1 }
 0x543   : > { %904 = vxpose.xlu0.b32.cont [3/4] (short) (narrow) %v900_v25, 8 }
 0x54b   : > { %905 = vxpose.xlu0.b32.end [4/4] (short) (narrow) %v901_v60, 8 }
 0x5d7   : > { %v918_v28 = vpop.trf.xlu0 }
 0x5d8   : > { %934 = vst.msk [vmem:[#allocation2] sm:$0xff] %vm495_vm0, %v918_v28 }
 0x5df   : > { %v935_v29 = vld [vmem:[#allocation2] sm:$0xff] }
 0x5e0   : > { %v936_v30 = vpack.c.bf16 %v935_v29, %v935_v29 }
 0x5e2   : > { %1243 = vmatmul.msk.bf16.vlgmr.msra.gmra.mxu2 %vm495_vm0, %v936_v30 }
 0x665   : > { %v969_v32 = vpop.f32.mrf.mxu2 }
 0x666   : > { %v970_v33 = vadd.f32 %v1353_v31, %v969_v32 }
 0x668   : > { %v1661_v34 = vadd.f32 %v970_v33, %v1579_v0  ;;  %v1293_v0 = vld [vmem:[%s1756_s10] sm:$0xff] }
 0x669   : > { %1037 = vmatpush.bf16.msra.mxu3 %v1293_v0 }
 0x66a   : > { %v974_v35 = vsel %vm495_vm0, %v1661_v34, 0.0 }
 0x66b   : > { %975 = vadd.xlane.f32.xlu1 %v974_v35 }
 0x66d   : > { %v971_v36 = vpop.f32.mrf.mxu2 }
 0x6de   : > { %v976_v37 = vpop.xlane.xlu1 %975 }
 0x6df   : > { %v977_v38 = vmul.f32 %v976_v37, %v1583_v8 }
 0x6e1   : > { %v978_v39 = vsub.f32 %v1661_v34, %v977_v38 }
 0x6e3   : > { %v979_v40 = vmul.f32 %v978_v39, %v978_v39 }
 0x6e5   : > { %v980_v41 = vsel %vm495_vm0, %v979_v40, 0.0 }
 0x6e6   : > { %981 = vadd.xlane.f32.xlu0 %v980_v41 }
 0x759   : > { %v982_v44 = vpop.xlane.xlu0 %981 }
 0x75a   : > { %v983_v45 = vmul.f32 %v982_v44, %v1583_v8  ;;  %v1298_v8 = vld [vmem:[%s1758_s12 + $0x18] sm:$0xff] }
 0x75b   : > { %1117 = vmatpush.bf16.msrb.mxu0 %v1298_v8 }
 0x75c   : > { %v984_v47 = vadd.f32 1e-05, %v983_v45 }
 0x75e   : > { %1378 = vrsqrt.f32 %v984_v47  ;;  %vm991_vm7 = vweird.f32 %v984_v47 }
 0x75f   : > { %1118 = vmatpush.bf16.msrb.mxu0 %v1297_v54 }
 0x763   : > { %1119 = vmatpush.bf16.msrb.mxu0 %v1296_v5 }
 0x764   : > { %v1379_v50 = vpop.eup %1378 }
 0x765   : > { %v986_v51 = vmul.f32 %v1379_v50, %v984_v47  ;;  %vm992_vm6 = vweird.f32 %v1379_v50 }
 0x766   : > { %vm993_vm8 = vmor %vm991_vm7, %vm992_vm6 }
 0x767   : > { %v987_v52 = vmul.f32 %v1379_v50, %v986_v51  ;;  %1120 = vmatpush.bf16.msrb.mxu0 %v1295_v6 }
 0x769   : > { %v988_v53 = vmul.f32 0.5, %v987_v52 }
 0x76b   : > { %v989_v55 = vsub.f32 1.5, %v988_v53 }
 0x76d   : > { %v990_v58 = vmul.f32 %v1379_v50, %v989_v55 }
 0x76f   : > { %v994_v62 = vsel %vm993_vm8, %v1379_v50, %v990_v58 }
 0x770   : > { %v995_v63 = vmul.f32 %v994_v62, %v978_v39 }
 0x772   : > { %v1000_v2 = vmul.f32 %v1354_v61, %v995_v63 }
 0x774   : > { %v1005_v3 = vadd.f32 %v1355_v1, %v1000_v2 }
 0x776   : > { %v1006_v4 = vpack.c.bf16 %v1005_v3, %v1005_v3 }
 0x778   : > { %1252 = vmatmul.msk.bf16.vlgmr.msra.gmra.mxu3 %vm495_vm0, %v1006_v4 }
 0x7fb   : > { %v1039_v10 = vpop.f32.mrf.mxu3 }
 0x7fc   : > { %v1040_v56 = vadd.f32 %v1356_v7, %v1039_v10 }
 0x7fe   : > { %v1043_v11 = vmax.f32 %v1040_v56, 0.0 }
 0x800   : > { %v1044_v12 = vpack.c.bf16 %v1043_v11, %v1043_v11 }
 0x802   : > { %1121 = vmatmul.bf16.vlgmr.msrb.gmra.mxu0 %v1044_v12 }
 0x803   : > { %v1041_v13 = vpop.f32.mrf.mxu3 }
 0x87f   : > { %v1122_v59 = vpop.f32.mrf.mxu0 }
 0x880   : > { %v1123_v15 = vadd.f32 %v1357_v14, %v1122_v59 }
 0x882   : > { %v1126_v16 = vadd.f32 %v1123_v15, %v1661_v34 }
 0x884   : > { %1127 = vst.msk [vmem:[%s469_s20] sm:$0xff] %vm495_vm0, %v1126_v16 }
 0x885   : > { %1407 = shalt.err (!%p1404_p3)
}
 0x886   : > { %1303 = dma.vmem_to_hbm [thread:$0]  (%p1561_p5), %s1142_s25, 128, %s1144_s3, %s1129_s17  }
 0x887   : > { %v1124_v17 = vpop.f32.mrf.mxu0 }
 0x888 PF: > { %p1309_p4 = scmp.ge.s32.totalorder %s1442_s16, 2  ;;  %s1155_s21 = sand.u32 1, %s1430_s29  }
 0x889   : > { %s1156_s18 = scalar_lea.sflag [#allocation4], %s1155_s21 }
 0x88a   : > { %p1306_p7 = pnand %p1309_p4, %p1565_p6 }
 0x88c   : > { %p1307_p8 = pneg %p1306_p7 }
 0x88e   : > { %1425 = dma.done.wait (%p1307_p8), %s1156_s18, 128  }
 0x88f   : > { %1427 = vsyncadd (%p1307_p8), %s1156_s18, 4294967168  ;;  %p24_p9 = scmp.ge.s32.totalorder %s1548_s19, 4   ;;  %s1773_s29 = smov %s1434_s30 }
 0x890   : > { %s1774_s30 = smov %s1438_s15  ;;  %s1775_s15 = smov %s1559_s22 }
 0x891   : > { %s1776_s16 = smov %s1548_s19  ;;  %26 = sbr.rel (!%p24_p9) target bundleno = 9 (0x9), region = 114 }
 0x896   :  { %1162 = vsyncpa [#allocation4], 1 }
 0x897   :  { %1164 = vsyncpa [#allocation4 + $0x1], 1 }

</bundles_post_ra>
